<compile_context>
chip_gen: v6e
topology: v6e:2x2x1
jax: 0.10.0
libtpu: 0.0.40
codegen_flags: <defaults>
</compile_context>

<pallas_src>
import functools

import jax
import jax.numpy as jnp
from jax.experimental import pallas as pl
from jax.experimental.pallas import tpu as pltpu


# ----------------------------------------------------------------------------------
# Kernel 1: batched matmul + bias + ReLU (used for both convs as patch matmuls).
#   x_ref: (1, M, K) bf16    w_ref: (K, N) bf16    b_ref: (1, N) f32
#   o_ref: (1, M, N)
# ----------------------------------------------------------------------------------
def _bmm_bias_relu_kernel(x_ref, w_ref, b_ref, o_ref):
    acc = jnp.dot(x_ref[0], w_ref[...], preferred_element_type=jnp.float32)
    acc = jnp.maximum(acc + b_ref[...], 0.0)
    o_ref[0] = acc.astype(o_ref.dtype)


def batched_linear_relu(x3, w, b, *, out_dtype=jnp.bfloat16):
    """x3: (B, M, K) bf16, w: (K, N) bf16, b: (1, N) f32 -> (B, M, N).

    One grid step per batch element (parallel -> megacore on v7x); the weight and bias
    blocks are index-map-constant so they stay resident in VMEM across the grid.
    """
    B, M, K = x3.shape
    K2, N = w.shape
    assert K == K2
    return pl.pallas_call(
        _bmm_bias_relu_kernel,
        out_shape=jax.ShapeDtypeStruct((B, M, N), out_dtype),
        grid=(B,),
        in_specs=[
            pl.BlockSpec((1, M, K), lambda i: (i, 0, 0)),
            pl.BlockSpec((K, N), lambda i: (0, 0)),
            pl.BlockSpec((1, N), lambda i: (0, 0)),
        ],
        out_specs=pl.BlockSpec((1, M, N), lambda i: (i, 0, 0)),
        compiler_params=pltpu.CompilerParams(dimension_semantics=("parallel",)),
    )(x3, w, b)


# ----------------------------------------------------------------------------------
# Kernel 2: fused FC head.
#   fc -> ReLU -> (sv1‖adv1) -> ReLU -> (block-diag sv2/adv2 with dueling combine
#   folded into the weights) -> q.
#   All intermediates ((B,128), (B,256)) never leave the kernel.
# ----------------------------------------------------------------------------------
def _head_kernel(x_ref, wfc_ref, bfc_ref, w1_ref, b1_ref, w2_ref, b2_ref, o_ref):
    # fc_hidden_layer_1 + ReLU
    x = jnp.dot(x_ref[...], wfc_ref[...], preferred_element_type=jnp.float32)
    x = jnp.maximum(x + bfc_ref[...], 0.0)
    # state_value_layer_1 ‖ advantage_layer_1 (concatenated columns) + ReLU
    h = jnp.dot(x.astype(jnp.bfloat16), w1_ref[...], preferred_element_type=jnp.float32)
    h = jnp.maximum(h + b1_ref[...], 0.0)
    # state_value_layer_2 / advantage_layer_2 (block-diagonal) with the dueling
    # combine q = V + A - mean(A, dim=-1) pre-folded into w2/b2 (exact, it is linear).
    q = jnp.dot(h.astype(jnp.bfloat16), w2_ref[...], preferred_element_type=jnp.float32)
    o_ref[...] = (q + b2_ref[...]).astype(o_ref.dtype)


def fused_head(x2, wfc, bfc, w1, b1, w2, b2):
    B = x2.shape[0]
    N = w2.shape[1]

    def full2(a):
        return pl.BlockSpec(a.shape, lambda i: (0, 0))

    return pl.pallas_call(
        _head_kernel,
        out_shape=jax.ShapeDtypeStruct((B, N), jnp.float32),
        grid=(1,),
        in_specs=[full2(x2), full2(wfc), full2(bfc),
                  full2(w1), full2(b1), full2(w2), full2(b2)],
        out_specs=pl.BlockSpec((B, N), lambda i: (0, 0)),
        compiler_params=pltpu.CompilerParams(dimension_semantics=("arbitrary",)),
    )(x2, wfc, bfc, w1, b1, w2, b2)


# ----------------------------------------------------------------------------------
# One-time parameter preparation (hoisted out of the forward).
# ----------------------------------------------------------------------------------
def prepare_params(params, *, act_dim, atoms, n_hid):
    f32, bf16 = jnp.float32, jnp.bfloat16

    # conv1: (32, C, 5, 5) -> (C*25, 32), rows in (C, kh, kw) order; zero-pad K to 128.
    k1 = params["conv1_w"].reshape(32, -1).T.astype(f32)
    kpad = 128
    k1 = jnp.pad(k1, ((0, kpad - k1.shape[0]), (0, 0)))

    # conv2: (64, 32, 5, 5) -> rows in (kh, kw, Cin) order -> (800, 64).
    k2 = params["conv2_w"].transpose(2, 3, 1, 0).reshape(-1, 64).astype(f32)

    # fc: the Pallas conv path flattens conv2's output spatial-major (col = s*64 + c),
    # PyTorch's .view(-1, 576) flattens channel-major (col = c*9 + s). Permute rows once.
    S = 9
    new = jnp.arange(S * 64)
    perm = (new % 64) * S + (new // 64)
    wfc = params["fc_w"][perm].astype(f32)

    # Stream layer 1: concatenate sv/adv columns -> single (n_hid, 2*n_hid) matmul.
    w1 = jnp.concatenate([params["sv1_w"], params["adv1_w"]], axis=1).astype(f32)
    b1 = jnp.concatenate([params["sv1_b"], params["adv1_b"]], axis=0).astype(f32)

    # Stream layer 2: block-diagonal so one (2*n_hid, atoms*(1+act_dim)) matmul yields
    # y = [state_value | advantage].
    na = atoms * act_dim
    w2 = jnp.zeros((2 * n_hid, atoms + na), f32)
    w2 = w2.at[:n_hid, :atoms].set(params["sv2_w"].astype(f32))
    w2 = w2.at[n_hid:, atoms:].set(params["adv2_w"].astype(f32))
    b2 = jnp.concatenate([params["sv2_b"], params["adv2_b"]], axis=0).astype(f32)

    # Fold the dueling combine: q[:, a*atoms+t] = sv[:, t] + adv[:, a*atoms+t]
    #                                             - mean_t' adv[:, a*atoms+t']
    # This is linear in y = [sv | adv]:  q = y @ G  =>  w2 <- w2 @ G,  b2 <- b2 @ G.
    g_sv = jnp.tile(jnp.eye(atoms, dtype=f32), (1, act_dim))                       # (atoms, na)
    g_adv = jnp.kron(jnp.eye(act_dim, dtype=f32),
                     jnp.eye(atoms, dtype=f32) - jnp.full((atoms, atoms), 1.0 / atoms, f32))
    g = jnp.concatenate([g_sv, g_adv], axis=0)                                     # (atoms+na, na)
    w2 = w2 @ g
    b2 = b2 @ g

    return {
        "conv1_w": k1.astype(bf16), "conv1_b": params["conv1_b"].reshape(1, -1).astype(f32),
        "conv2_w": k2.astype(bf16), "conv2_b": params["conv2_b"].reshape(1, -1).astype(f32),
        "fc_w": wfc.astype(bf16),   "fc_b": params["fc_b"].reshape(1, -1).astype(f32),
        "h1_w": w1.astype(bf16),    "h1_b": b1.reshape(1, -1),
        "h2_w": w2.astype(bf16),    "h2_b": b2.reshape(1, -1),
    }


# ----------------------------------------------------------------------------------
# Forward (3 pallas_calls; all inter-kernel hand-offs are contiguous reshapes).
# ----------------------------------------------------------------------------------
@functools.partial(jax.jit, static_argnames=("act_dim", "atoms"))
def dueling_forward(prep, states, *, act_dim, atoms):
    B, C, H, W = states.shape
    assert H == 75 and W == 75  # conv_output_dim = 576 implies 75x75 input

    # conv1 patch extraction, emitted directly in conv2-patch row order
    # (b, pi, pj, ki, kj) so conv1 -> conv2 is a contiguous (free) reshape.
    x = states.reshape(B, C, 3, 5, 5, 3, 5, 5)        # (B, C, pi, ki, u, pj, kj, v)
    x = x.transpose(0, 2, 5, 3, 6, 1, 4, 7)           # (B, pi, pj, ki, kj, C, u, v)
    p1 = x.reshape(B, 225, C * 25)
    kpad = prep["conv1_w"].shape[0]
    p1 = jnp.pad(p1, ((0, 0), (0, 0), (0, kpad - C * 25))).astype(jnp.bfloat16)

    h1 = batched_linear_relu(p1, prep["conv1_w"], prep["conv1_b"])   # (B, 225, 32) bf16
    p2 = h1.reshape(B, 9, 25 * 32)                                   # contiguous
    h2 = batched_linear_relu(p2, prep["conv2_w"], prep["conv2_b"])   # (B, 9, 64) bf16
    x2 = h2.reshape(B, 9 * 64)                                       # contiguous

    q = fused_head(x2, prep["fc_w"], prep["fc_b"],
                   prep["h1_w"], prep["h1_b"], prep["h2_w"], prep["h2_b"])  # (B, act*atoms)
    return q.reshape(B, act_dim, atoms)


# ----------------------------------------------------------------------------------
# Deterministic parameter init (PyTorch-layout shapes) and pure-JAX f32 reference.
# ----------------------------------------------------------------------------------
def init_params(key, *, frame_hist, act_dim, atoms, n_hid, conv_output_dim=576):
    def uni(k, shape, fan_in):
        bound = 1.0 / jnp.sqrt(jnp.float32(fan_in))
        return jax.random.uniform(k, shape, jnp.float32, -bound, bound)

    ks = jax.random.split(key, 16)
    p = {}
    p["conv1_w"] = uni(ks[0], (32, frame_hist, 5, 5), frame_hist * 25)
    p["conv1_b"] = uni(ks[1], (32,), frame_hist * 25)
    p["conv2_w"] = uni(ks[2], (64, 32, 5, 5), 32 * 25)
    p["conv2_b"] = uni(ks[3], (64,), 32 * 25)
    p["fc_w"] = uni(ks[4], (conv_output_dim, n_hid), conv_output_dim)
    p["fc_b"] = uni(ks[5], (n_hid,), conv_output_dim)
    p["sv1_w"] = uni(ks[6], (n_hid, n_hid), n_hid)
    p["sv1_b"] = uni(ks[7], (n_hid,), n_hid)
    p["sv2_w"] = uni(ks[8], (n_hid, atoms), n_hid)
    p["sv2_b"] = uni(ks[9], (atoms,), n_hid)
    p["adv1_w"] = uni(ks[10], (n_hid, n_hid), n_hid)
    p["adv1_b"] = uni(ks[11], (n_hid,), n_hid)
    p["adv2_w"] = uni(ks[12], (n_hid, atoms * act_dim), n_hid)
    p["adv2_b"] = uni(ks[13], (atoms * act_dim,), n_hid)
    return p


def reference_forward(params, states, *, act_dim, atoms):
    """Pure-JAX f32 reference of the original PyTorch forward (validation only)."""
    hi = jax.lax.Precision.HIGHEST
    x = jax.lax.conv_general_dilated(
        states, params["conv1_w"], window_strides=(5, 5), padding="VALID",
        dimension_numbers=("NCHW", "OIHW", "NCHW"), precision=hi)
    x = jax.nn.relu(x + params["conv1_b"][None, :, None, None])
    x = jax.lax.conv_general_dilated(
        x, params["conv2_w"], window_strides=(5, 5), padding="VALID",
        dimension_numbers=("NCHW", "OIHW", "NCHW"), precision=hi)
    x = jax.nn.relu(x + params["conv2_b"][None, :, None, None])
    x = x.reshape(x.shape[0], -1)                     # NCHW flatten == .view(-1, 576)
    x = jax.nn.relu(jnp.dot(x, params["fc_w"], precision=hi) + params["fc_b"])
    sv = jax.nn.relu(jnp.dot(x, params["sv1_w"], precision=hi) + params["sv1_b"])
    sv = (jnp.dot(sv, params["sv2_w"], precision=hi) + params["sv2_b"]).reshape(-1, 1, atoms)
    adv = jax.nn.relu(jnp.dot(x, params["adv1_w"], precision=hi) + params["adv1_b"])
    adv = (jnp.dot(adv, params["adv2_w"], precision=hi)
           + params["adv2_b"]).reshape(-1, act_dim, atoms)
    return sv + adv - jnp.mean(adv, axis=-1, keepdims=True)


# ----------------------------------------------------------------------------------
if __name__ == "__main__":
    B, FRAME_HIST, H, W = 2, 4, 75, 75
    ACT_DIM, ATOMS, N_HID = 6, 1, 128

    key = jax.random.PRNGKey(0)
    k_states, k_params = jax.random.split(key)

    states = jax.random.normal(k_states, (B, FRAME_HIST, H, W), dtype=jnp.float32)
    params = init_params(k_params, frame_hist=FRAME_HIST, act_dim=ACT_DIM,
                         atoms=ATOMS, n_hid=N_HID)
    prep = prepare_params(params, act_dim=ACT_DIM, atoms=ATOMS, n_hid=N_HID)

    q = dueling_forward(prep, states, act_dim=ACT_DIM, atoms=ATOMS)
    q = jax.block_until_ready(q)

    assert q.shape == (B, ACT_DIM, ATOMS)
    assert q.dtype == jnp.float32
    assert bool(jnp.all(jnp.isfinite(q)))

    # Validate layout/permutation/dueling-fold against the f32 reference (bf16 matmuls
    # in the Pallas path -> loose tolerance).
    q_ref = reference_forward(params, states, act_dim=ACT_DIM, atoms=ATOMS)
    max_err = float(jnp.max(jnp.abs(q - q_ref)))
    assert max_err < 2e-2, f"max abs error vs reference: {max_err}"

    print("KERNEL_OK")
</pallas_src>

<mosaic_0001>
module attributes {stable_mosaic.version = 11 : i64} {
  func.func @_bmm_bias_relu_kernel(%arg0: i32, %arg1: memref<1x225x128xbf16, #tpu.memory_space<vmem>>, %arg2: memref<128x32xbf16, #tpu.memory_space<vmem>>, %arg3: memref<1x32xf32, #tpu.memory_space<vmem>>, %arg4: memref<1x225x32xbf16, #tpu.memory_space<vmem>>) attributes {dimension_semantics = [#tpu.dimension_semantics<parallel>], iteration_bounds = array<i64: 2>, scalar_prefetch = 0 : i64, scratch_operands = 0 : i64, tpu.core_type = #tpu.core_type<tc>, window_params = [{transform_indices = @transform_0, window_bounds = array<i64: 1, 225, 128>}, {pipeline_mode = #tpu.pipeline_mode<synchronous>, transform_indices = @transform_1, window_bounds = array<i64: 128, 32>}, {pipeline_mode = #tpu.pipeline_mode<synchronous>, transform_indices = @transform_2, window_bounds = array<i64: 1, 32>}, {transform_indices = @transform_3, window_bounds = array<i64: 1, 225, 32>}]} {
    %c0 = arith.constant 0 : index
    %c0_0 = arith.constant 0 : index
    %c0_1 = arith.constant 0 : index
    %0 = vector.load %arg1[%c0, %c0_0, %c0_1] : memref<1x225x128xbf16, #tpu.memory_space<vmem>>, vector<1x225x128xbf16>
    %1 = vector.shape_cast %0 : vector<1x225x128xbf16> to vector<225x128xbf16>
    %c0_2 = arith.constant 0 : index
    %c0_3 = arith.constant 0 : index
    %2 = vector.load %arg2[%c0_2, %c0_3] : memref<128x32xbf16, #tpu.memory_space<vmem>>, vector<128x32xbf16>
    %cst = arith.constant dense<0.000000e+00> : vector<225x32xf32>
    %3 = tpu.matmul %1, %2, %cst {dimension_numbers = #tpu.dot_dimension_numbers<[1], [0], [0], [1], [0, 0, 1, 1], [], []>} : vector<225x128xbf16>, vector<128x32xbf16>, vector<225x32xf32> -> vector<225x32xf32>
    %c0_4 = arith.constant 0 : index
    %c0_5 = arith.constant 0 : index
    %4 = vector.load %arg3[%c0_4, %c0_5] : memref<1x32xf32, #tpu.memory_space<vmem>>, vector<1x32xf32>
    %5 = vector.broadcast %4 : vector<1x32xf32> to vector<225x32xf32>
    %6 = arith.addf %3, %5 : vector<225x32xf32>
    %cst_6 = arith.constant 0.000000e+00 : f32
    %7 = vector.broadcast %cst_6 : f32 to vector<225x32xf32>
    %8 = arith.maximumf %6, %7 : vector<225x32xf32>
    %9 = arith.truncf %8 : vector<225x32xf32> to vector<225x32xbf16>
    %c0_7 = arith.constant 0 : index
    %c0_8 = arith.constant 0 : index
    %c0_9 = arith.constant 0 : index
    %10 = vector.load %arg4[%c0_7, %c0_8, %c0_9] : memref<1x225x32xbf16, #tpu.memory_space<vmem>>, vector<1x225x32xbf16>
    %11 = vector.shape_cast %10 : vector<1x225x32xbf16> to vector<225x32xbf16>
    %12 = vector.shape_cast %9 : vector<225x32xbf16> to vector<1x225x32xbf16>
    tpu.vector_store %arg4[%c0_7, %c0_8, %c0_9], %12 {strides = array<i32>} : memref<1x225x32xbf16, #tpu.memory_space<vmem>>, vector<1x225x32xbf16>,
    return
  }
  func.func @transform_0(%arg0: i32) -> (i32, i32, i32) {
    %c0_i32 = arith.constant 0 : i32
    %c0_i32_0 = arith.constant 0 : i32
    %c0_i32_1 = arith.constant 0 : i32
    return %arg0, %c0_i32, %c0_i32_0 : i32, i32, i32
  }
  func.func @transform_1(%arg0: i32) -> (i32, i32) {
    %c0_i32 = arith.constant 0 : i32
    %c0_i32_0 = arith.constant 0 : i32
    %c0_i32_1 = arith.constant 0 : i32
    return %c0_i32, %c0_i32_0 : i32, i32
  }
  func.func @transform_2(%arg0: i32) -> (i32, i32) {
    %c0_i32 = arith.constant 0 : i32
    %c0_i32_0 = arith.constant 0 : i32
    %c0_i32_1 = arith.constant 0 : i32
    return %c0_i32, %c0_i32_0 : i32, i32
  }
  func.func @transform_3(%arg0: i32) -> (i32, i32, i32) {
    %c0_i32 = arith.constant 0 : i32
    %c0_i32_0 = arith.constant 0 : i32
    %c0_i32_1 = arith.constant 0 : i32
    return %arg0, %c0_i32, %c0_i32_0 : i32, i32, i32
  }
}

module attributes {stable_mosaic.version = 11 : i64} {
  func.func @_bmm_bias_relu_kernel(%arg0: i32, %arg1: memref<1x9x800xbf16, #tpu.memory_space<vmem>>, %arg2: memref<800x64xbf16, #tpu.memory_space<vmem>>, %arg3: memref<1x64xf32, #tpu.memory_space<vmem>>, %arg4: memref<1x9x64xbf16, #tpu.memory_space<vmem>>) attributes {dimension_semantics = [#tpu.dimension_semantics<parallel>], iteration_bounds = array<i64: 2>, scalar_prefetch = 0 : i64, scratch_operands = 0 : i64, tpu.core_type = #tpu.core_type<tc>, window_params = [{transform_indices = @transform_0, window_bounds = array<i64: 1, 9, 800>}, {pipeline_mode = #tpu.pipeline_mode<synchronous>, transform_indices = @transform_1, window_bounds = array<i64: 800, 64>}, {pipeline_mode = #tpu.pipeline_mode<synchronous>, transform_indices = @transform_2, window_bounds = array<i64: 1, 64>}, {transform_indices = @transform_3, window_bounds = array<i64: 1, 9, 64>}]} {
    %c0 = arith.constant 0 : index
    %c0_0 = arith.constant 0 : index
    %c0_1 = arith.constant 0 : index
    %0 = vector.load %arg1[%c0, %c0_0, %c0_1] : memref<1x9x800xbf16, #tpu.memory_space<vmem>>, vector<1x9x800xbf16>
    %1 = vector.shape_cast %0 : vector<1x9x800xbf16> to vector<9x800xbf16>
    %c0_2 = arith.constant 0 : index
    %c0_3 = arith.constant 0 : index
    %2 = vector.load %arg2[%c0_2, %c0_3] : memref<800x64xbf16, #tpu.memory_space<vmem>>, vector<800x64xbf16>
    %cst = arith.constant dense<0.000000e+00> : vector<9x64xf32>
    %3 = tpu.matmul %1, %2, %cst {dimension_numbers = #tpu.dot_dimension_numbers<[1], [0], [0], [1], [0, 0, 1, 1], [], []>} : vector<9x800xbf16>, vector<800x64xbf16>, vector<9x64xf32> -> vector<9x64xf32>
    %c0_4 = arith.constant 0 : index
    %c0_5 = arith.constant 0 : index
    %4 = vector.load %arg3[%c0_4, %c0_5] : memref<1x64xf32, #tpu.memory_space<vmem>>, vector<1x64xf32>
    %5 = vector.broadcast %4 : vector<1x64xf32> to vector<9x64xf32>
    %6 = arith.addf %3, %5 : vector<9x64xf32>
    %cst_6 = arith.constant 0.000000e+00 : f32
    %7 = vector.broadcast %cst_6 : f32 to vector<9x64xf32>
    %8 = arith.maximumf %6, %7 : vector<9x64xf32>
    %9 = arith.truncf %8 : vector<9x64xf32> to vector<9x64xbf16>
    %c0_7 = arith.constant 0 : index
    %c0_8 = arith.constant 0 : index
    %c0_9 = arith.constant 0 : index
    %10 = vector.load %arg4[%c0_7, %c0_8, %c0_9] : memref<1x9x64xbf16, #tpu.memory_space<vmem>>, vector<1x9x64xbf16>
    %11 = vector.shape_cast %10 : vector<1x9x64xbf16> to vector<9x64xbf16>
    %12 = vector.shape_cast %9 : vector<9x64xbf16> to vector<1x9x64xbf16>
    tpu.vector_store %arg4[%c0_7, %c0_8, %c0_9], %12 {strides = array<i32>} : memref<1x9x64xbf16, #tpu.memory_space<vmem>>, vector<1x9x64xbf16>,
    return
  }
  func.func @transform_0(%arg0: i32) -> (i32, i32, i32) {
    %c0_i32 = arith.constant 0 : i32
    %c0_i32_0 = arith.constant 0 : i32
    %c0_i32_1 = arith.constant 0 : i32
    return %arg0, %c0_i32, %c0_i32_0 : i32, i32, i32
  }
  func.func @transform_1(%arg0: i32) -> (i32, i32) {
    %c0_i32 = arith.constant 0 : i32
    %c0_i32_0 = arith.constant 0 : i32
    %c0_i32_1 = arith.constant 0 : i32
    return %c0_i32, %c0_i32_0 : i32, i32
  }
  func.func @transform_2(%arg0: i32) -> (i32, i32) {
    %c0_i32 = arith.constant 0 : i32
    %c0_i32_0 = arith.constant 0 : i32
    %c0_i32_1 = arith.constant 0 : i32
    return %c0_i32, %c0_i32_0 : i32, i32
  }
  func.func @transform_3(%arg0: i32) -> (i32, i32, i32) {
    %c0_i32 = arith.constant 0 : i32
    %c0_i32_0 = arith.constant 0 : i32
    %c0_i32_1 = arith.constant 0 : i32
    return %arg0, %c0_i32, %c0_i32_0 : i32, i32, i32
  }
}

module attributes {stable_mosaic.version = 11 : i64} {
  func.func @_head_kernel(%arg0: i32, %arg1: memref<2x576xbf16, #tpu.memory_space<vmem>>, %arg2: memref<576x128xbf16, #tpu.memory_space<vmem>>, %arg3: memref<1x128xf32, #tpu.memory_space<vmem>>, %arg4: memref<128x256xbf16, #tpu.memory_space<vmem>>, %arg5: memref<1x256xf32, #tpu.memory_space<vmem>>, %arg6: memref<256x6xbf16, #tpu.memory_space<vmem>>, %arg7: memref<1x6xf32, #tpu.memory_space<vmem>>, %arg8: memref<2x6xf32, #tpu.memory_space<vmem>>) attributes {dimension_semantics = [#tpu.dimension_semantics<arbitrary>], iteration_bounds = array<i64: 1>, scalar_prefetch = 0 : i64, scratch_operands = 0 : i64, tpu.core_type = #tpu.core_type<tc>, window_params = [{pipeline_mode = #tpu.pipeline_mode<synchronous>, transform_indices = @transform_0, window_bounds = array<i64: 2, 576>}, {pipeline_mode = #tpu.pipeline_mode<synchronous>, transform_indices = @transform_1, window_bounds = array<i64: 576, 128>}, {pipeline_mode = #tpu.pipeline_mode<synchronous>, transform_indices = @transform_2, window_bounds = array<i64: 1, 128>}, {pipeline_mode = #tpu.pipeline_mode<synchronous>, transform_indices = @transform_3, window_bounds = array<i64: 128, 256>}, {pipeline_mode = #tpu.pipeline_mode<synchronous>, transform_indices = @transform_4, window_bounds = array<i64: 1, 256>}, {pipeline_mode = #tpu.pipeline_mode<synchronous>, transform_indices = @transform_5, window_bounds = array<i64: 256, 6>}, {pipeline_mode = #tpu.pipeline_mode<synchronous>, transform_indices = @transform_6, window_bounds = array<i64: 1, 6>}, {pipeline_mode = #tpu.pipeline_mode<synchronous>, transform_indices = @transform_7, window_bounds = array<i64: 2, 6>}]} {
    %c0 = arith.constant 0 : index
    %c0_0 = arith.constant 0 : index
    %0 = vector.load %arg1[%c0, %c0_0] : memref<2x576xbf16, #tpu.memory_space<vmem>>, vector<2x576xbf16>
    %c0_1 = arith.constant 0 : index
    %c0_2 = arith.constant 0 : index
    %1 = vector.load %arg2[%c0_1, %c0_2] : memref<576x128xbf16, #tpu.memory_space<vmem>>, vector<576x128xbf16>
    %cst = arith.constant dense<0.000000e+00> : vector<2x128xf32>
    %2 = tpu.matmul %0, %1, %cst {dimension_numbers = #tpu.dot_dimension_numbers<[1], [0], [0], [1], [0, 0, 1, 1], [], []>} : vector<2x576xbf16>, vector<576x128xbf16>, vector<2x128xf32> -> vector<2x128xf32>
    %c0_3 = arith.constant 0 : index
    %c0_4 = arith.constant 0 : index
    %3 = vector.load %arg3[%c0_3, %c0_4] : memref<1x128xf32, #tpu.memory_space<vmem>>, vector<1x128xf32>
    %4 = vector.broadcast %3 : vector<1x128xf32> to vector<2x128xf32>
    %5 = arith.addf %2, %4 : vector<2x128xf32>
    %cst_5 = arith.constant 0.000000e+00 : f32
    %6 = vector.broadcast %cst_5 : f32 to vector<2x128xf32>
    %7 = arith.maximumf %5, %6 : vector<2x128xf32>
    %8 = arith.truncf %7 : vector<2x128xf32> to vector<2x128xbf16>
    %c0_6 = arith.constant 0 : index
    %c0_7 = arith.constant 0 : index
    %9 = vector.load %arg4[%c0_6, %c0_7] : memref<128x256xbf16, #tpu.memory_space<vmem>>, vector<128x256xbf16>
    %cst_8 = arith.constant dense<0.000000e+00> : vector<2x256xf32>
    %10 = tpu.matmul %8, %9, %cst_8 {dimension_numbers = #tpu.dot_dimension_numbers<[1], [0], [0], [1], [0, 0, 1, 1], [], []>} : vector<2x128xbf16>, vector<128x256xbf16>, vector<2x256xf32> -> vector<2x256xf32>
    %c0_9 = arith.constant 0 : index
    %c0_10 = arith.constant 0 : index
    %11 = vector.load %arg5[%c0_9, %c0_10] : memref<1x256xf32, #tpu.memory_space<vmem>>, vector<1x256xf32>
    %12 = vector.broadcast %11 : vector<1x256xf32> to vector<2x256xf32>
    %13 = arith.addf %10, %12 : vector<2x256xf32>
    %cst_11 = arith.constant 0.000000e+00 : f32
    %14 = vector.broadcast %cst_11 : f32 to vector<2x256xf32>
    %15 = arith.maximumf %13, %14 : vector<2x256xf32>
    %16 = arith.truncf %15 : vector<2x256xf32> to vector<2x256xbf16>
    %c0_12 = arith.constant 0 : index
    %c0_13 = arith.constant 0 : index
    %17 = vector.load %arg6[%c0_12, %c0_13] : memref<256x6xbf16, #tpu.memory_space<vmem>>, vector<256x6xbf16>
    %cst_14 = arith.constant dense<0.000000e+00> : vector<2x6xf32>
    %18 = tpu.matmul %16, %17, %cst_14 {dimension_numbers = #tpu.dot_dimension_numbers<[1], [0], [0], [1], [0, 0, 1, 1], [], []>} : vector<2x256xbf16>, vector<256x6xbf16>, vector<2x6xf32> -> vector<2x6xf32>
    %c0_15 = arith.constant 0 : index
    %c0_16 = arith.constant 0 : index
    %19 = vector.load %arg7[%c0_15, %c0_16] : memref<1x6xf32, #tpu.memory_space<vmem>>, vector<1x6xf32>
    %20 = vector.broadcast %19 : vector<1x6xf32> to vector<2x6xf32>
    %21 = arith.addf %18, %20 : vector<2x6xf32>
    %c0_17 = arith.constant 0 : index
    %c0_18 = arith.constant 0 : index
    %22 = vector.load %arg8[%c0_17, %c0_18] : memref<2x6xf32, #tpu.memory_space<vmem>>, vector<2x6xf32>
    tpu.vector_store %arg8[%c0_17, %c0_18], %21 {strides = array<i32>} : memref<2x6xf32, #tpu.memory_space<vmem>>, vector<2x6xf32>,
    return
  }
  func.func @transform_0(%arg0: i32) -> (i32, i32) {
    %c0_i32 = arith.constant 0 : i32
    %c0_i32_0 = arith.constant 0 : i32
    %c0_i32_1 = arith.constant 0 : i32
    return %c0_i32, %c0_i32_0 : i32, i32
  }
  func.func @transform_1(%arg0: i32) -> (i32, i32) {
    %c0_i32 = arith.constant 0 : i32
    %c0_i32_0 = arith.constant 0 : i32
    %c0_i32_1 = arith.constant 0 : i32
    return %c0_i32, %c0_i32_0 : i32, i32
  }
  func.func @transform_2(%arg0: i32) -> (i32, i32) {
    %c0_i32 = arith.constant 0 : i32
    %c0_i32_0 = arith.constant 0 : i32
    %c0_i32_1 = arith.constant 0 : i32
    return %c0_i32, %c0_i32_0 : i32, i32
  }
  func.func @transform_3(%arg0: i32) -> (i32, i32) {
    %c0_i32 = arith.constant 0 : i32
    %c0_i32_0 = arith.constant 0 : i32
    %c0_i32_1 = arith.constant 0 : i32
    return %c0_i32, %c0_i32_0 : i32, i32
  }
  func.func @transform_4(%arg0: i32) -> (i32, i32) {
    %c0_i32 = arith.constant 0 : i32
    %c0_i32_0 = arith.constant 0 : i32
    %c0_i32_1 = arith.constant 0 : i32
    return %c0_i32, %c0_i32_0 : i32, i32
  }
  func.func @transform_5(%arg0: i32) -> (i32, i32) {
    %c0_i32 = arith.constant 0 : i32
    %c0_i32_0 = arith.constant 0 : i32
    %c0_i32_1 = arith.constant 0 : i32
    return %c0_i32, %c0_i32_0 : i32, i32
  }
  func.func @transform_6(%arg0: i32) -> (i32, i32) {
    %c0_i32 = arith.constant 0 : i32
    %c0_i32_0 = arith.constant 0 : i32
    %c0_i32_1 = arith.constant 0 : i32
    return %c0_i32, %c0_i32_0 : i32, i32
  }
  func.func @transform_7(%arg0: i32) -> (i32, i32) {
    %c0_i32 = arith.constant 0 : i32
    %c0_i32_0 = arith.constant 0 : i32
    %c0_i32_1 = arith.constant 0 : i32
    return %c0_i32, %c0_i32_0 : i32, i32
  }
}

</mosaic_0001>

<bundles_post_ra>
// kernel: dueling_forward.3
= control target key start
LH: loop header
LB: loop body
LE: loop exit
PB: predicated region body
PF: predicated region fallthrough
CT: control target
= control target key end

     0   :  { %s1018_s12 = smov 0   ;;  %s1223_s0 = inlined_call_operand.vmem [shape: bf16[2,225,128], index: 0, kind: input, shape index: {}]   ;;  %s1224_s1 = inlined_call_operand.vmem [shape: bf16[128,32], index: 1, kind: input, shape index: {}]   ;;  %s1225_s2 = inlined_call_operand.vmem [shape: f32[1,32], index: 2, kind: input, shape index: {}]   ;;  %s1226_s3 = inlined_call_operand.vmem [shape: bf16[2,225,32], index: 3, kind: output, shape index: {}]  }
   0x1 LB: > { %s748_s13 = sadd.s32 4294967295, %s994_s12   ;;  %p752_p0 = scmp.ge.s32.totalorder %s994_s12, 1  ;;  %s994_s12 = sphi %s1018_s12, %s13_s12  }
   0x2   : > { %p137_p1 = scmp.lt.s32.totalorder %s994_s12, 3 }
   0x4   : > { %p138_p2 = pnand %p752_p0, %p137_p1 }
   0x5   : > { %p161_p3 = scmp.lt.s32.totalorder (!%p138_p2), %s748_s13, 1 }
   0x6   : > { %141 = sbr.rel (%p138_p2) target bundleno = 304 (0x130), region = 32 }
   0xb   : > { %v965_v0 = vld [vmem:[%s1224_s1 + $0x38] sm:$0xff]   ;;  %v996_v1 = vmov 0.0   ;;  %v966_v2 = vld [vmem:[%s1224_s1 + $0x30] sm:$0xff]   ;;  %vm997_vm0 = vmmov 0   ;;  %s1228_s13 = smov (!%p161_p3, %s748_s13), 1  ;;  %v967_v3 = vld [vmem:[%s1224_s1 + $0x28] sm:$0xff]  }
   0xc   : > { %862 = vmatprep.subr.bf16.mxu0 %v996_v1  ;;  %938 = vmatprep.subr.bf16.mxu1 %v996_v1  ;;  %s954_s20 = smul.u32 116, %s1228_s13  ;;  %v968_v4 = vld [vmem:[%s1224_s1 + $0x20] sm:$0xff]   ;;  %v969_v5 = vld [vmem:[%s1224_s1 + $0x18] sm:$0xff]   ;;  %v970_v6 = vld [vmem:[%s1224_s1 + $0x10] sm:$0xff]   ;;  %vm658_vm1 = vcmask 257024   ;;  %vm687_vm2 = vcmask 253952  }
   0xd   : > { %863 = vmatpush3.bf16.msra.mxu0 %v965_v0  ;;  %946 = vmatpush3.bf16.msra.mxu1 %v965_v0  ;;  %v971_v7 = vld [vmem:[%s1224_s1 + $0x8] sm:$0xff]   ;;  %v972_v8 = vld [vmem:[%s1224_s1] sm:$0xff]   ;;  %vm688_vm3 = vsmask.f32 256 }
   0xe   : > { %864 = vmatprep.subr.bf16.mxu0 %v996_v1  ;;  %939 = vmatprep.subr.bf16.mxu1 %v996_v1  ;;  %s1053_s23 = scalar_lea.vmem %s1223_s0, %s954_s20  ;;  %v1124_v24 = vld [vmem:[%s1225_s2] ss:$0 sm:$0xff]  ;;  %s1133_s11 = scalar_lea.vmem %s1226_s3, %s954_s20  ;;  %vm689_vm4 = vmand %vm687_vm2, %vm688_vm3 }
   0xf   : > { %878 = vmatprep.mubr.msk.bf16.mxu0 %vm997_vm0, %v996_v1  ;;  %910 = vmatprep.mubr.msk.bf16.mxu1 %vm997_vm0, %v996_v1  ;;  %v973_v9 = vld [vmem:[%s1053_s23] sm:$0xff]   ;;  %v975_v11 = vld [vmem:[%s1053_s23 + $0x8] sm:$0xff]   ;;  %v977_v13 = vld [vmem:[%s1053_s23 + $0x10] sm:$0xff]  }
  0x10   : > { %v974_v10 = vld [vmem:[%s1053_s23 + $0x40] sm:$0xff]   ;;  %v976_v12 = vld [vmem:[%s1053_s23 + $0x48] sm:$0xff]   ;;  %v978_v14 = vld [vmem:[%s1053_s23 + $0x50] sm:$0xff]  }
  0x11   : > { %865 = vmatpush3.bf16.msra.mxu0 %v966_v2  ;;  %947 = vmatpush3.bf16.msra.mxu1 %v966_v2  ;;  %v979_v15 = vld [vmem:[%s1053_s23 + $0x18] sm:$0xff]   ;;  %v981_v17 = vld [vmem:[%s1053_s23 + $0x20] sm:$0xff]   ;;  %v983_v19 = vld [vmem:[%s1053_s23 + $0x28] sm:$0xff]  }
  0x12   : > { %866 = vmatprep.subr.bf16.mxu0 %v996_v1  ;;  %940 = vmatprep.subr.bf16.mxu1 %v996_v1  ;;  %v980_v16 = vld [vmem:[%s1053_s23 + $0x58] sm:$0xff]   ;;  %v982_v18 = vld [vmem:[%s1053_s23 + $0x60] sm:$0xff]   ;;  %v984_v20 = vld [vmem:[%s1053_s23 + $0x68] sm:$0xff]  }
  0x13   : > { %v985_v21 = vld [vmem:[%s1053_s23 + $0x30] sm:$0xff]   ;;  %v987_v23 = vld [vmem:[%s1053_s23 + $0x38] sm:$0xff]  }
  0x14   : > { %v986_v22 = vld [vmem:[%s1053_s23 + $0x70] ss:$0 sps:$4 sm:$0x11]  }
  0x15   : > { %867 = vmatpush3.bf16.msra.mxu0 %v967_v3  ;;  %948 = vmatpush3.bf16.msra.mxu1 %v967_v3 }
  0x16   : > { %868 = vmatprep.subr.bf16.mxu0 %v996_v1  ;;  %941 = vmatprep.subr.bf16.mxu1 %v996_v1 }
  0x19   : > { %869 = vmatpush3.bf16.msra.mxu0 %v968_v4  ;;  %949 = vmatpush3.bf16.msra.mxu1 %v968_v4 }
  0x1a   : > { %870 = vmatprep.subr.bf16.mxu0 %v996_v1  ;;  %942 = vmatprep.subr.bf16.mxu1 %v996_v1 }
  0x1d   : > { %871 = vmatpush3.bf16.msra.mxu0 %v969_v5  ;;  %950 = vmatpush3.bf16.msra.mxu1 %v969_v5 }
  0x1e   : > { %872 = vmatprep.subr.bf16.mxu0 %v996_v1  ;;  %943 = vmatprep.subr.bf16.mxu1 %v996_v1 }
  0x21   : > { %873 = vmatpush3.bf16.msra.mxu0 %v970_v6  ;;  %951 = vmatpush3.bf16.msra.mxu1 %v970_v6 }
  0x22   : > { %874 = vmatprep.subr.bf16.mxu0 %v996_v1  ;;  %944 = vmatprep.subr.bf16.mxu1 %v996_v1 }
  0x25   : > { %875 = vmatpush3.bf16.msra.mxu0 %v971_v7  ;;  %952 = vmatpush3.bf16.msra.mxu1 %v971_v7 }
  0x26   : > { %876 = vmatprep.subr.bf16.mxu0 %v996_v1  ;;  %945 = vmatprep.subr.bf16.mxu1 %v996_v1 }
  0x29   : > { %877 = vmatpush3.bf16.msra.mxu0 %v972_v8  ;;  %953 = vmatpush3.bf16.msra.mxu1 %v972_v8 }
  0x2c   : > { %879 = vmatmul.mubr.bf16.vlgmr.msra.gmra.mxu0 %v973_v9  ;;  %911 = vmatmul.mubr.bf16.vlgmr.msra.gmra.mxu1 %v974_v10 }
  0x2d   : > { %882 = vmatprep.mubr.msk.bf16.mxu0 %vm997_vm0, %v996_v1  ;;  %914 = vmatprep.mubr.msk.bf16.mxu1 %vm997_vm0, %v996_v1 }
  0x34   : > { %883 = vmatmul.mubr.bf16.gmra.mxu0 %v975_v11  ;;  %915 = vmatmul.mubr.bf16.gmra.mxu1 %v976_v12 }
  0x35   : > { %886 = vmatprep.mubr.msk.bf16.mxu0 %vm997_vm0, %v996_v1  ;;  %918 = vmatprep.mubr.msk.bf16.mxu1 %vm997_vm0, %v996_v1 }
  0x3c   : > { %887 = vmatmul.mubr.bf16.gmra.mxu0 %v977_v13  ;;  %919 = vmatmul.mubr.bf16.gmra.mxu1 %v978_v14 }
  0x3d   : > { %890 = vmatprep.mubr.msk.bf16.mxu0 %vm997_vm0, %v996_v1  ;;  %922 = vmatprep.mubr.msk.bf16.mxu1 %vm997_vm0, %v996_v1 }
  0x44   : > { %891 = vmatmul.mubr.bf16.gmra.mxu0 %v979_v15  ;;  %923 = vmatmul.mubr.bf16.gmra.mxu1 %v980_v16 }
  0x45   : > { %894 = vmatprep.mubr.msk.bf16.mxu0 %vm997_vm0, %v996_v1  ;;  %926 = vmatprep.mubr.msk.bf16.mxu1 %vm997_vm0, %v996_v1 }
  0x4c   : > { %895 = vmatmul.mubr.bf16.gmra.mxu0 %v981_v17  ;;  %927 = vmatmul.mubr.bf16.gmra.mxu1 %v982_v18 }
  0x4d   : > { %898 = vmatprep.mubr.msk.bf16.mxu0 %vm997_vm0, %v996_v1  ;;  %930 = vmatprep.mubr.msk.bf16.mxu1 %vm997_vm0, %v996_v1 }
  0x54   : > { %899 = vmatmul.mubr.bf16.gmra.mxu0 %v983_v19  ;;  %931 = vmatmul.mubr.bf16.gmra.mxu1 %v984_v20 }
  0x55   : > { %902 = vmatprep.mubr.msk.bf16.mxu0 %vm997_vm0, %v996_v1  ;;  %934 = vmatprep.mubr.msk.bf16.mxu1 %vm997_vm0, %v996_v1 }
  0x5c   : > { %903 = vmatmul.mubr.bf16.gmra.mxu0 %v985_v21  ;;  %935 = vmatmul.mubr.bf16.gmra.mxu1 %v986_v22 }
  0x5d   : > { %906 = vmatprep.mubr.msk.bf16.mxu0 %vm997_vm0, %v996_v1 }
  0x64   : > { %907 = vmatmul.mubr.bf16.gmra.mxu0 %v987_v23 }
  0xec   : > { %v394_v25 = vpop.f32.mrf.mxu0  ;;  %v458_v26 = vpop.f32.mrf.mxu1 }
  0xed   : > { %v395_v27 = vadd.f32 %v1124_v24, %v394_v25  ;;  %v459_v28 = vadd.f32 %v1124_v24, %v458_v26 }
  0xee   : > { %v880_v29 = vpop.f32.mrf.mxu0  ;;  %v912_v30 = vpop.f32.mrf.mxu1 }
  0xef   : > { %v512_v31 = vmax.f32 %v395_v27, 0.0  ;;  %v528_v32 = vmax.f32 %v459_v28, 0.0 }
  0xf0   : > { %v397_v33 = vpop.f32.mrf.mxu0  ;;  %v461_v34 = vpop.f32.mrf.mxu1 }
  0xf1   : > { %v810_v35 = vpack.c.bf16 %v512_v31, %v512_v31  ;;  %v398_v36 = vadd.f32 %v1124_v24, %v397_v33  ;;  %v826_v37 = vpack.c.bf16 %v528_v32, %v528_v32  ;;  %v462_v38 = vadd.f32 %v1124_v24, %v461_v34 }
  0xf2   : > { %v881_v39 = vpop.f32.mrf.mxu0  ;;  %v913_v40 = vpop.f32.mrf.mxu1 }
  0xf3   : > { %659 = vst.msk [vmem:[%s1133_s11] sm:$0xf] %vm658_vm1, %v810_v35  ;;  %v513_v41 = vmax.f32 %v398_v36, 0.0  ;;  %675 = vst.msk [vmem:[%s1133_s11 + $0x40] sm:$0xf] %vm658_vm1, %v826_v37  ;;  %v529_v42 = vmax.f32 %v462_v38, 0.0 }
  0xf4   : > { %v402_v43 = vpop.f32.mrf.mxu0  ;;  %v466_v44 = vpop.f32.mrf.mxu1 }
  0xf5   : > { %v811_v45 = vpack.c.bf16 %v513_v41, %v513_v41  ;;  %v403_v46 = vadd.f32 %v1124_v24, %v402_v43  ;;  %v827_v47 = vpack.c.bf16 %v529_v42, %v529_v42  ;;  %v467_v48 = vadd.f32 %v1124_v24, %v466_v44 }
  0xf6   : > { %v884_v49 = vpop.f32.mrf.mxu0  ;;  %v916_v50 = vpop.f32.mrf.mxu1 }
  0xf7   : > { %660 = vst.msk [vmem:[%s1133_s11 + $0x4] sm:$0xf] %vm658_vm1, %v811_v45  ;;  %v514_v51 = vmax.f32 %v403_v46, 0.0  ;;  %676 = vst.msk [vmem:[%s1133_s11 + $0x44] sm:$0xf] %vm658_vm1, %v827_v47  ;;  %v530_v52 = vmax.f32 %v467_v48, 0.0 }
  0xf8   : > { %v405_v53 = vpop.f32.mrf.mxu0  ;;  %v469_v54 = vpop.f32.mrf.mxu1 }
  0xf9   : > { %v812_v55 = vpack.c.bf16 %v514_v51, %v514_v51  ;;  %v406_v56 = vadd.f32 %v1124_v24, %v405_v53  ;;  %v828_v57 = vpack.c.bf16 %v530_v52, %v530_v52  ;;  %v470_v58 = vadd.f32 %v1124_v24, %v469_v54 }
  0xfa   : > { %v885_v59 = vpop.f32.mrf.mxu0  ;;  %v917_v60 = vpop.f32.mrf.mxu1 }
  0xfb   : > { %661 = vst.msk [vmem:[%s1133_s11 + $0x8] sm:$0xf] %vm658_vm1, %v812_v55  ;;  %v515_v61 = vmax.f32 %v406_v56, 0.0  ;;  %677 = vst.msk [vmem:[%s1133_s11 + $0x48] sm:$0xf] %vm658_vm1, %v828_v57  ;;  %v531_v62 = vmax.f32 %v470_v58, 0.0 }
  0xfc   : > { %v410_v63 = vpop.f32.mrf.mxu0  ;;  %v474_v0 = vpop.f32.mrf.mxu1 }
  0xfd   : > { %v813_v1 = vpack.c.bf16 %v515_v61, %v515_v61  ;;  %v411_v2 = vadd.f32 %v1124_v24, %v410_v63  ;;  %v829_v3 = vpack.c.bf16 %v531_v62, %v531_v62  ;;  %v475_v4 = vadd.f32 %v1124_v24, %v474_v0 }
  0xfe   : > { %v888_v5 = vpop.f32.mrf.mxu0  ;;  %v920_v6 = vpop.f32.mrf.mxu1 }
  0xff   : > { %662 = vst.msk [vmem:[%s1133_s11 + $0xc] sm:$0xf] %vm658_vm1, %v813_v1  ;;  %v516_v7 = vmax.f32 %v411_v2, 0.0  ;;  %678 = vst.msk [vmem:[%s1133_s11 + $0x4c] sm:$0xf] %vm658_vm1, %v829_v3  ;;  %v532_v8 = vmax.f32 %v475_v4, 0.0 }
 0x100   : > { %v413_v9 = vpop.f32.mrf.mxu0  ;;  %v477_v10 = vpop.f32.mrf.mxu1 }
 0x101   : > { %v814_v11 = vpack.c.bf16 %v516_v7, %v516_v7  ;;  %v414_v12 = vadd.f32 %v1124_v24, %v413_v9  ;;  %v830_v13 = vpack.c.bf16 %v532_v8, %v532_v8  ;;  %v478_v14 = vadd.f32 %v1124_v24, %v477_v10 }
 0x102   : > { %v889_v15 = vpop.f32.mrf.mxu0  ;;  %v921_v16 = vpop.f32.mrf.mxu1 }
 0x103   : > { %663 = vst.msk [vmem:[%s1133_s11 + $0x10] sm:$0xf] %vm658_vm1, %v814_v11  ;;  %v517_v17 = vmax.f32 %v414_v12, 0.0  ;;  %679 = vst.msk [vmem:[%s1133_s11 + $0x50] sm:$0xf] %vm658_vm1, %v830_v13  ;;  %v533_v18 = vmax.f32 %v478_v14, 0.0 }
 0x104   : > { %v418_v19 = vpop.f32.mrf.mxu0  ;;  %v482_v20 = vpop.f32.mrf.mxu1 }
 0x105   : > { %v815_v21 = vpack.c.bf16 %v517_v17, %v517_v17  ;;  %v419_v22 = vadd.f32 %v1124_v24, %v418_v19  ;;  %v831_v23 = vpack.c.bf16 %v533_v18, %v533_v18  ;;  %v483_v25 = vadd.f32 %v1124_v24, %v482_v20 }
 0x106   : > { %v892_v26 = vpop.f32.mrf.mxu0  ;;  %v924_v27 = vpop.f32.mrf.mxu1 }
 0x107   : > { %664 = vst.msk [vmem:[%s1133_s11 + $0x14] sm:$0xf] %vm658_vm1, %v815_v21  ;;  %v518_v28 = vmax.f32 %v419_v22, 0.0  ;;  %680 = vst.msk [vmem:[%s1133_s11 + $0x54] sm:$0xf] %vm658_vm1, %v831_v23  ;;  %v534_v29 = vmax.f32 %v483_v25, 0.0 }
 0x108   : > { %v421_v30 = vpop.f32.mrf.mxu0  ;;  %v485_v31 = vpop.f32.mrf.mxu1 }
 0x109   : > { %v816_v32 = vpack.c.bf16 %v518_v28, %v518_v28  ;;  %v422_v33 = vadd.f32 %v1124_v24, %v421_v30  ;;  %v832_v34 = vpack.c.bf16 %v534_v29, %v534_v29  ;;  %v486_v35 = vadd.f32 %v1124_v24, %v485_v31  ;;  %v690_v28 = vld [vmem:[%s1133_s11 + $0x70] sm:$0x1] }
 0x10a   : > { %v893_v36 = vpop.f32.mrf.mxu0  ;;  %v925_v37 = vpop.f32.mrf.mxu1 }
 0x10b   : > { %665 = vst.msk [vmem:[%s1133_s11 + $0x18] sm:$0xf] %vm658_vm1, %v816_v32  ;;  %v519_v38 = vmax.f32 %v422_v33, 0.0  ;;  %681 = vst.msk [vmem:[%s1133_s11 + $0x58] sm:$0xf] %vm658_vm1, %v832_v34  ;;  %v535_v39 = vmax.f32 %v486_v35, 0.0 }
 0x10c   : > { %v426_v40 = vpop.f32.mrf.mxu0  ;;  %v490_v41 = vpop.f32.mrf.mxu1 }
 0x10d   : > { %v817_v42 = vpack.c.bf16 %v519_v38, %v519_v38  ;;  %v427_v43 = vadd.f32 %v1124_v24, %v426_v40  ;;  %v833_v44 = vpack.c.bf16 %v535_v39, %v535_v39  ;;  %v491_v45 = vadd.f32 %v1124_v24, %v490_v41 }
 0x10e   : > { %v896_v46 = vpop.f32.mrf.mxu0  ;;  %v928_v47 = vpop.f32.mrf.mxu1 }
 0x10f   : > { %666 = vst.msk [vmem:[%s1133_s11 + $0x1c] sm:$0xf] %vm658_vm1, %v817_v42  ;;  %v520_v48 = vmax.f32 %v427_v43, 0.0  ;;  %682 = vst.msk [vmem:[%s1133_s11 + $0x5c] sm:$0xf] %vm658_vm1, %v833_v44  ;;  %v536_v49 = vmax.f32 %v491_v45, 0.0 }
 0x110   : > { %v429_v50 = vpop.f32.mrf.mxu0  ;;  %v493_v51 = vpop.f32.mrf.mxu1 }
 0x111   : > { %v818_v52 = vpack.c.bf16 %v520_v48, %v520_v48  ;;  %v430_v53 = vadd.f32 %v1124_v24, %v429_v50  ;;  %v834_v54 = vpack.c.bf16 %v536_v49, %v536_v49  ;;  %v494_v55 = vadd.f32 %v1124_v24, %v493_v51 }
 0x112   : > { %v897_v56 = vpop.f32.mrf.mxu0  ;;  %v929_v57 = vpop.f32.mrf.mxu1 }
 0x113   : > { %667 = vst.msk [vmem:[%s1133_s11 + $0x20] sm:$0xf] %vm658_vm1, %v818_v52  ;;  %v521_v58 = vmax.f32 %v430_v53, 0.0  ;;  %683 = vst.msk [vmem:[%s1133_s11 + $0x60] sm:$0xf] %vm658_vm1, %v834_v54  ;;  %v537_v59 = vmax.f32 %v494_v55, 0.0 }
 0x114   : > { %v434_v60 = vpop.f32.mrf.mxu0  ;;  %v498_v61 = vpop.f32.mrf.mxu1 }
 0x115   : > { %v819_v62 = vpack.c.bf16 %v521_v58, %v521_v58  ;;  %v435_v63 = vadd.f32 %v1124_v24, %v434_v60  ;;  %v835_v0 = vpack.c.bf16 %v537_v59, %v537_v59  ;;  %v499_v1 = vadd.f32 %v1124_v24, %v498_v61 }
 0x116   : > { %v900_v2 = vpop.f32.mrf.mxu0  ;;  %v932_v3 = vpop.f32.mrf.mxu1 }
 0x117   : > { %668 = vst.msk [vmem:[%s1133_s11 + $0x24] sm:$0xf] %vm658_vm1, %v819_v62  ;;  %v522_v4 = vmax.f32 %v435_v63, 0.0  ;;  %684 = vst.msk [vmem:[%s1133_s11 + $0x64] sm:$0xf] %vm658_vm1, %v835_v0  ;;  %v538_v5 = vmax.f32 %v499_v1, 0.0 }
 0x118   : > { %v437_v6 = vpop.f32.mrf.mxu0  ;;  %v501_v7 = vpop.f32.mrf.mxu1 }
 0x119   : > { %v820_v8 = vpack.c.bf16 %v522_v4, %v522_v4  ;;  %v438_v9 = vadd.f32 %v1124_v24, %v437_v6  ;;  %v836_v10 = vpack.c.bf16 %v538_v5, %v538_v5  ;;  %v502_v11 = vadd.f32 %v1124_v24, %v501_v7 }
 0x11a   : > { %v901_v12 = vpop.f32.mrf.mxu0  ;;  %v933_v13 = vpop.f32.mrf.mxu1 }
 0x11b   : > { %669 = vst.msk [vmem:[%s1133_s11 + $0x28] sm:$0xf] %vm658_vm1, %v820_v8  ;;  %v523_v14 = vmax.f32 %v438_v9, 0.0  ;;  %685 = vst.msk [vmem:[%s1133_s11 + $0x68] sm:$0xf] %vm658_vm1, %v836_v10  ;;  %v539_v15 = vmax.f32 %v502_v11, 0.0 }
 0x11c   : > { %v442_v16 = vpop.f32.mrf.mxu0  ;;  %v506_v17 = vpop.f32.mrf.mxu1 }
 0x11d   : > { %v821_v18 = vpack.c.bf16 %v523_v14, %v523_v14  ;;  %v443_v19 = vadd.f32 %v1124_v24, %v442_v16  ;;  %v837_v20 = vpack.c.bf16 %v539_v15, %v539_v15  ;;  %v507_v21 = vadd.f32 %v1124_v24, %v506_v17 }
 0x11e   : > { %v904_v22 = vpop.f32.mrf.mxu0  ;;  %v936_v23 = vpop.f32.mrf.mxu1 }
 0x11f   : > { %670 = vst.msk [vmem:[%s1133_s11 + $0x2c] sm:$0xf] %vm658_vm1, %v821_v18  ;;  %v524_v25 = vmax.f32 %v443_v19, 0.0  ;;  %686 = vst.msk [vmem:[%s1133_s11 + $0x6c] sm:$0xf] %vm658_vm1, %v837_v20  ;;  %v540_v26 = vmax.f32 %v507_v21, 0.0 }
 0x120   : > { %v445_v27 = vpop.f32.mrf.mxu0  ;;  %v509_v29 = vpop.f32.mrf.mxu1 }
 0x121   : > { %v822_v30 = vpack.c.bf16 %v524_v25, %v524_v25  ;;  %v446_v31 = vadd.f32 %v1124_v24, %v445_v27  ;;  %v838_v32 = vpack.c.bf16 %v540_v26, %v540_v26 }
 0x122   : > { %v905_v33 = vpop.f32.mrf.mxu0  ;;  %v937_v34 = vpop.f32.mrf.mxu1 }
 0x123   : > { %671 = vst.msk [vmem:[%s1133_s11 + $0x30] sm:$0xf] %vm658_vm1, %v822_v30  ;;  %v525_v35 = vmax.f32 %v446_v31, 0.0  ;;  %v691_v36 = vsel %vm689_vm4, %v838_v32, %v690_v28 }
 0x124   : > { %692 = vst [vmem:[%s1133_s11 + $0x70] sm:$0x1] %v691_v36  ;;  %v450_v37 = vpop.f32.mrf.mxu0 }
 0x125   : > { %v823_v38 = vpack.c.bf16 %v525_v35, %v525_v35  ;;  %v451_v39 = vadd.f32 %v1124_v24, %v450_v37 }
 0x126   : > { %v908_v40 = vpop.f32.mrf.mxu0 }
 0x127   : > { %672 = vst.msk [vmem:[%s1133_s11 + $0x34] sm:$0xf] %vm658_vm1, %v823_v38  ;;  %v526_v41 = vmax.f32 %v451_v39, 0.0 }
 0x128   : > { %v453_v42 = vpop.f32.mrf.mxu0 }
 0x129   : > { %v824_v43 = vpack.c.bf16 %v526_v41, %v526_v41  ;;  %v454_v44 = vadd.f32 %v1124_v24, %v453_v42 }
 0x12a   : > { %v909_v45 = vpop.f32.mrf.mxu0 }
 0x12b   : > { %673 = vst.msk [vmem:[%s1133_s11 + $0x38] sm:$0xf] %vm658_vm1, %v824_v43  ;;  %v527_v46 = vmax.f32 %v454_v44, 0.0 }
 0x12d   : > { %v825_v47 = vpack.c.bf16 %v527_v46, %v527_v46 }
 0x12f   : > { %674 = vst.msk [vmem:[%s1133_s11 + $0x3c] sm:$0xf] %vm658_vm1, %v825_v47 }
 0x130 PF: > { %s13_s12 = sadd.s32 1, %s994_s12  }
 0x131   : > { %p10_p4 = scmp.ge.s32.totalorder %s13_s12, 4  }
 0x133   :  { %12 = sbr.rel (!%p10_p4) target bundleno = 1 (0x1), region = 62 }

// kernel: dueling_forward.4
= control target key start
LH: loop header
LB: loop body
LE: loop exit
PB: predicated region body
PF: predicated region fallthrough
CT: control target
= control target key end

     0   :  { %s1115_s12 = smov 0   ;;  %s1302_s0 = inlined_call_operand.vmem [shape: bf16[2,9,800], index: 0, kind: input, shape index: {}]   ;;  %s1303_s1 = inlined_call_operand.vmem [shape: bf16[800,64], index: 1, kind: input, shape index: {}]   ;;  %s1304_s2 = inlined_call_operand.vmem [shape: f32[1,64], index: 2, kind: input, shape index: {}]   ;;  %s1305_s3 = inlined_call_operand.vmem [shape: bf16[2,9,64], index: 3, kind: output, shape index: {}]  }
   0x1 LB: > { %s863_s13 = sadd.s32 4294967295, %s1091_s12   ;;  %p867_p0 = scmp.ge.s32.totalorder %s1091_s12, 1  ;;  %s1091_s12 = sphi %s1115_s12, %s13_s12  }
   0x2   : > { %p137_p1 = scmp.lt.s32.totalorder %s1091_s12, 3 }
   0x4   : > { %p138_p2 = pnand %p867_p0, %p137_p1 }
   0x5   : > { %p161_p3 = scmp.lt.s32.totalorder (!%p138_p2), %s863_s13, 1 }
   0x6   : > { %141 = sbr.rel (%p138_p2) target bundleno = 287 (0x11f), region = 32 }
   0xb   : > { %v1025_v0 = vld [vmem:[%s1303_s1 + $0x78] sm:$0xff]   ;;  %v1029_v4 = vld [vmem:[%s1303_s1 + $0x70] sm:$0xff]   ;;  %v1033_v8 = vld [vmem:[%s1303_s1 + $0x68] sm:$0xff]   ;;  %s1307_s13 = smov (!%p161_p3, %s863_s13), 1  ;;  %v1093_v37 = vmov 0.0   ;;  %vm1094_vm0 = vmmov 0  }
   0xc   : > { %v1026_v1 = vld [vmem:[%s1303_s1 + $0x38] sm:$0xff]   ;;  %937 = vmatprep.subr.bf16.mxu0 %v1025_v0  ;;  %v1030_v5 = vld [vmem:[%s1303_s1 + $0x30] sm:$0xff]   ;;  %v1034_v9 = vld [vmem:[%s1303_s1 + $0x28] sm:$0xff]   ;;  %s1014_s14 = smul.u32 56, %s1307_s13  ;;  %vm622_vm1 = vcmask 261120   ;;  %vm800_vm2 = vcmask 519168  }
   0xd   : > { %v1027_v2 = vld [vmem:[%s1303_s1 + $0xf8] sm:$0xff]   ;;  %938 = vmatpush3.bf16.msra.mxu0 %v1026_v1  ;;  %v1031_v6 = vld [vmem:[%s1303_s1 + $0xf0] sm:$0xff]   ;;  %v1035_v10 = vld [vmem:[%s1303_s1 + $0xe8] sm:$0xff]   ;;  %vm802_vm3 = vcmask 516096   ;;  %vm803_vm4 = vsmask.f32 256 }
   0xe   : > { %v1028_v3 = vld [vmem:[%s1303_s1 + $0xb8] sm:$0xff]   ;;  %959 = vmatprep.subr.bf16.mxu1 %v1027_v2  ;;  %939 = vmatprep.subr.bf16.mxu0 %v1029_v4  ;;  %v1032_v7 = vld [vmem:[%s1303_s1 + $0xb0] sm:$0xff]   ;;  %v1036_v11 = vld [vmem:[%s1303_s1 + $0xa8] sm:$0xff]   ;;  %s1220_s25 = scalar_lea.vmem %s1302_s0, %s1014_s14 }
   0xf   : > { %960 = vmatpush3.bf16.msra.mxu1 %v1028_v3  ;;  %v1037_v12 = vld [vmem:[%s1303_s1 + $0x60] sm:$0xff]   ;;  %v1041_v16 = vld [vmem:[%s1303_s1 + $0x58] sm:$0xff]   ;;  %v1045_v20 = vld [vmem:[%s1303_s1 + $0x50] sm:$0xff]  }
  0x10   : > { %961 = vmatprep.subr.bf16.mxu1 %v1031_v6  ;;  %v1038_v13 = vld [vmem:[%s1303_s1 + $0x20] sm:$0xff]   ;;  %v1042_v17 = vld [vmem:[%s1303_s1 + $0x18] sm:$0xff]   ;;  %v1046_v21 = vld [vmem:[%s1303_s1 + $0x10] sm:$0xff]  }
  0x11   : > { %940 = vmatpush3.bf16.msra.mxu0 %v1030_v5  ;;  %v1039_v14 = vld [vmem:[%s1303_s1 + $0xe0] sm:$0xff]   ;;  %v1043_v18 = vld [vmem:[%s1303_s1 + $0xd8] sm:$0xff]   ;;  %v1047_v22 = vld [vmem:[%s1303_s1 + $0xd0] sm:$0xff]  }
  0x12   : > { %941 = vmatprep.subr.bf16.mxu0 %v1033_v8  ;;  %v1040_v15 = vld [vmem:[%s1303_s1 + $0xa0] sm:$0xff]   ;;  %v1044_v19 = vld [vmem:[%s1303_s1 + $0x98] sm:$0xff]   ;;  %v1048_v23 = vld [vmem:[%s1303_s1 + $0x90] sm:$0xff]  }
  0x13   : > { %962 = vmatpush3.bf16.msra.mxu1 %v1032_v7  ;;  %v1049_v24 = vld [vmem:[%s1303_s1 + $0x48] sm:$0xff]   ;;  %v1053_v28 = vld [vmem:[%s1303_s1 + $0x40] sm:$0xff]   ;;  %v1060_v34 = vld [vmem:[%s1303_s1 + $0x178] sm:$0xff]  }
  0x14   : > { %963 = vmatprep.subr.bf16.mxu1 %v1035_v10  ;;  %v1050_v25 = vld [vmem:[%s1303_s1 + $0x8] sm:$0xff]   ;;  %v1054_v29 = vld [vmem:[%s1303_s1] sm:$0xff]   ;;  %v1064_v38 = vld [vmem:[%s1303_s1 + $0x138] sm:$0xff]  }
  0x15   : > { %942 = vmatpush3.bf16.msra.mxu0 %v1034_v9  ;;  %v1051_v26 = vld [vmem:[%s1303_s1 + $0xc8] sm:$0xff]   ;;  %v1055_v30 = vld [vmem:[%s1303_s1 + $0xc0] sm:$0xff]   ;;  %v1065_v39 = vld [vmem:[%s1303_s1 + $0x170] sm:$0xff]  }
  0x16   : > { %943 = vmatprep.subr.bf16.mxu0 %v1037_v12  ;;  %v1052_v27 = vld [vmem:[%s1303_s1 + $0x88] sm:$0xff]   ;;  %v1056_v31 = vld [vmem:[%s1220_s25] ss:$28 sps:$4 sm:$0x1f]   ;;  %v1066_v40 = vld [vmem:[%s1303_s1 + $0x130] sm:$0xff]  }
  0x17   : > { %964 = vmatpush3.bf16.msra.mxu1 %v1036_v11  ;;  %v1058_v32 = vld [vmem:[%s1220_s25 + $0x4] ss:$28 sps:$4 sm:$0x1f]   ;;  %v1063_v36 = vld [vmem:[%s1220_s25 + $0xc] ss:$28 sps:$4 sm:$0x1f]   ;;  %vm804_vm5 = vmand %vm802_vm3, %vm803_vm4 }
  0x18   : > { %965 = vmatprep.subr.bf16.mxu1 %v1039_v14  ;;  %v1059_v33 = vld [vmem:[%s1303_s1 + $0x80] sm:$0xff]   ;;  %658 = vmatprep.mubr.bf16.mxu0 %v1058_v32  ;;  %v1067_v41 = vld [vmem:[%s1303_s1 + $0x168] sm:$0xff]   ;;  %v1071_v45 = vld [vmem:[%s1303_s1 + $0x158] sm:$0xff]  }
  0x19   : > { %944 = vmatpush3.bf16.msra.mxu0 %v1038_v13  ;;  %v1061_v35 = vld [vmem:[%s1220_s25 + $0x8] ss:$28 sps:$4 sm:$0x1f]   ;;  %699 = vmatprep.mubr.bf16.mxu1 %v1063_v36  ;;  %v1072_v47 = vld [vmem:[%s1303_s1 + $0x118] sm:$0xff]   ;;  %v1073_v48 = vld [vmem:[%s1303_s1 + $0x150] sm:$0xff]  }
  0x1a   : > { %945 = vmatprep.subr.bf16.mxu0 %v1041_v16  ;;  %v1068_v42 = vld [vmem:[%s1303_s1 + $0x128] sm:$0xff]   ;;  %v1069_v43 = vld [vmem:[%s1303_s1 + $0x160] sm:$0xff]   ;;  %v1074_v50 = vld [vmem:[%s1303_s1 + $0x110] sm:$0xff]  }
  0x1b   : > { %966 = vmatpush3.bf16.msra.mxu1 %v1040_v15  ;;  %v1070_v44 = vld [vmem:[%s1303_s1 + $0x120] sm:$0xff]   ;;  %v1077_v46 = vld [vmem:[%s1303_s1 + $0x188] sm:$0xff]   ;;  %v1083_v51 = vld [vmem:[%s1220_s25 + $0x14] ss:$28 sps:$4 sm:$0x1f]  }
  0x1c   : > { %967 = vmatprep.subr.bf16.mxu1 %v1043_v18  ;;  %v1080_v49 = vld [vmem:[%s1303_s1 + $0x180] sm:$0xff]   ;;  %v1075_v52 = vld [vmem:[%s1303_s1 + $0x148] sm:$0xff]   ;;  %v1084_v53 = vld [vmem:[%s1220_s25 + $0x18] ss:$28 sps:$4 sm:$0x1f]  }
  0x1d   : > { %946 = vmatpush3.bf16.msra.mxu0 %v1042_v17  ;;  %v1076_v54 = vld [vmem:[%s1303_s1 + $0x108] sm:$0xff]   ;;  %v1078_v55 = vld [vmem:[%s1303_s1 + $0x140] sm:$0xff]  }
  0x1e   : > { %947 = vmatprep.subr.bf16.mxu0 %v1045_v20  ;;  %v1079_v56 = vld [vmem:[%s1303_s1 + $0x100] sm:$0xff]   ;;  %v1081_v57 = vld [vmem:[%s1220_s25 + $0x10] ss:$28 sps:$4 sm:$0x1f]   ;;  %s934_s25 = sshll.u32 %s1307_s13, 3 }
  0x1f   : > { %968 = vmatpush3.bf16.msra.mxu1 %v1044_v19  ;;  %v871_v6 = vld [vmem:[%s1304_s2] ss:$0 sm:$0xff]  ;;  %s170_s23 = scalar_lea.vmem %s1305_s3, %s934_s25 }
  0x20   : > { %969 = vmatprep.subr.bf16.mxu1 %v1047_v22 }
  0x21   : > { %948 = vmatpush3.bf16.msra.mxu0 %v1046_v21 }
  0x22   : > { %949 = vmatprep.subr.bf16.mxu0 %v1049_v24 }
  0x23   : > { %970 = vmatpush3.bf16.msra.mxu1 %v1048_v23 }
  0x24   : > { %971 = vmatprep.subr.bf16.mxu1 %v1051_v26 }
  0x25   : > { %950 = vmatpush3.bf16.msra.mxu0 %v1050_v25 }
  0x26   : > { %951 = vmatprep.subr.bf16.mxu0 %v1053_v28  ;;  %v805_v28 = vld [vmem:[%s170_s23 + $0x4] sm:$0x1] }
  0x27   : > { %972 = vmatpush3.bf16.msra.mxu1 %v1052_v27 }
  0x28   : > { %973 = vmatprep.subr.bf16.mxu1 %v1055_v30 }
  0x29   : > { %952 = vmatpush3.bf16.msra.mxu0 %v1054_v29 }
  0x2a   : > { %981 = vmatprep.subr.bf16.mxu0 %v1060_v34 }
  0x2b   : > { %974 = vmatpush3.bf16.msra.mxu1 %v1059_v33 }
  0x2c   : > { %659 = vmatmul.mubr.bf16.vlgmr.msra.gmra.mxu0 %v1056_v31  ;;  %1006 = vmatprep.subr.bf16.mxu1 %v1093_v37 }
  0x2d   : > { %982 = vmatpush3.bf16.msra.mxu0 %v1064_v38  ;;  %740 = vmatprep.mubr.bf16.mxu0 %v1083_v51 }
  0x2e   : > { %700 = vmatmul.mubr.bf16.vlgmr.msra.gmra.mxu1 %v1061_v35  ;;  %983 = vmatprep.subr.bf16.mxu0 %v1065_v39 }
  0x2f   : > { %1010 = vmatprep.mubr.msk.bf16.mxu1 %vm1094_vm0, %v1093_v37  ;;  %1007 = vmatpush3.bf16.msra.mxu1 %v1077_v46 }
  0x30   : > { %1008 = vmatprep.subr.bf16.mxu1 %v1093_v37 }
  0x31   : > { %984 = vmatpush3.bf16.msra.mxu0 %v1066_v40 }
  0x32   : > { %985 = vmatprep.subr.bf16.mxu0 %v1067_v41 }
  0x33   : > { %1009 = vmatpush3.bf16.msra.mxu1 %v1080_v49 }
  0x35   : > { %986 = vmatpush3.bf16.msra.mxu0 %v1068_v42 }
  0x36   : > { %987 = vmatprep.subr.bf16.mxu0 %v1069_v43  ;;  %1011 = vmatmul.mubr.msk.bf16.vlgmr.msra.gmra.mxu1 %vm622_vm1, %v1084_v53 }
  0x39   : > { %988 = vmatpush3.bf16.msra.mxu0 %v1070_v44 }
  0x3a   : > { %989 = vmatprep.subr.bf16.mxu0 %v1071_v45 }
  0x3d   : > { %990 = vmatpush3.bf16.msra.mxu0 %v1072_v47 }
  0x3e   : > { %991 = vmatprep.subr.bf16.mxu0 %v1073_v48 }
  0x41   : > { %992 = vmatpush3.bf16.msra.mxu0 %v1074_v50 }
  0x42   : > { %993 = vmatprep.subr.bf16.mxu0 %v1075_v52 }
  0x45   : > { %994 = vmatpush3.bf16.msra.mxu0 %v1076_v54 }
  0x46   : > { %995 = vmatprep.subr.bf16.mxu0 %v1078_v55 }
  0x49   : > { %996 = vmatpush3.bf16.msra.mxu0 %v1079_v56 }
  0x4c   : > { %741 = vmatmul.mubr.bf16.vlgmr.msra.gmra.mxu0 %v1081_v57 }
  0xec   : > { %v953_v61 = vpop.f32.mrf.mxu0 }
  0xee   : > { %v975_v58 = vpop.f32.mrf.mxu1  ;;  %v954_v63 = vpop.f32.mrf.mxu0 }
  0xef   : > { %v955_v4 = vadd.f32 %v954_v63, %v953_v61 }
  0xf0   : > { %v976_v59 = vpop.f32.mrf.mxu1  ;;  %v956_v2 = vpop.f32.mrf.mxu0 }
  0xf1   : > { %v661_v8 = vadd.f32 %v955_v4, %v871_v6  ;;  %v977_v9 = vadd.f32 %v976_v59, %v975_v58 }
  0xf2   : > { %v978_v60 = vpop.f32.mrf.mxu1  ;;  %v957_v7 = vpop.f32.mrf.mxu0 }
  0xf3   : > { %v958_v10 = vadd.f32 %v957_v7, %v956_v2  ;;  %v702_v13 = vadd.f32 %v977_v9, %v661_v8 }
  0xf4   : > { %v979_v62 = vpop.f32.mrf.mxu1 }
  0xf5   : > { %v664_v14 = vadd.f32 %v958_v10, %v871_v6  ;;  %v980_v15 = vadd.f32 %v979_v62, %v978_v60 }
  0xf6   : > { %v783_v0 = vpop.f32.mrf.mxu1 }
  0xf7   : > { %v705_v20 = vadd.f32 %v980_v15, %v664_v14 }
  0xf8   : > { %v1012_v1 = vpop.f32.mrf.mxu1 }
  0xfa   : > { %v786_v3 = vpop.f32.mrf.mxu1 }
  0xfc   : > { %v1013_v5 = vpop.f32.mrf.mxu1 }
 0x10c   : > { %v997_v11 = vpop.f32.mrf.mxu0 }
 0x10e   : > { %v998_v12 = vpop.f32.mrf.mxu0 }
 0x10f   : > { %v999_v16 = vadd.f32 %v998_v12, %v997_v11 }
 0x110   : > { %v1000_v17 = vpop.f32.mrf.mxu0 }
 0x111   : > { %v743_v18 = vadd.f32 %v999_v16, %v702_v13 }
 0x112   : > { %v1001_v19 = vpop.f32.mrf.mxu0 }
 0x113   : > { %v784_v21 = vadd.f32 %v783_v0, %v743_v18  ;;  %v1002_v22 = vadd.f32 %v1001_v19, %v1000_v17 }
 0x115   : > { %v790_v23 = vmax.f32 %v784_v21, 0.0  ;;  %v746_v24 = vadd.f32 %v1002_v22, %v705_v20 }
 0x117   : > { %v935_v25 = vpack.c.bf16 %v790_v23, %v790_v23  ;;  %v787_v26 = vadd.f32 %v786_v3, %v746_v24 }
 0x119   : > { %801 = vst.msk [vmem:[%s170_s23] sm:$0xf] %vm800_vm2, %v935_v25  ;;  %v791_v27 = vmax.f32 %v787_v26, 0.0 }
 0x11b   : > { %v936_v29 = vpack.c.bf16 %v791_v27, %v791_v27 }
 0x11d   : > { %v806_v30 = vsel %vm804_vm5, %v936_v29, %v805_v28 }
 0x11e   : > { %807 = vst [vmem:[%s170_s23 + $0x4] sm:$0x1] %v806_v30 }
 0x11f PF: > { %s13_s12 = sadd.s32 1, %s1091_s12  }
 0x120   : > { %p10_p4 = scmp.ge.s32.totalorder %s13_s12, 4  }
 0x122   :  { %12 = sbr.rel (!%p10_p4) target bundleno = 1 (0x1), region = 62 }

// kernel: dueling_forward.5
= control target key start
LH: loop header
LB: loop body
LE: loop exit
PB: predicated region body
PF: predicated region fallthrough
CT: control target
= control target key end

     0   :  { %v113_v29 = vlaneseq  ;;  %v1096_v32 = vmov 1966171168   ;;  %v1097_v36 = vmov 0.0   ;;  %vm1098_vm0 = vmmov 0   ;;  %s1365_s0 = inlined_call_operand.vmem [shape: bf16[2,576], index: 0, kind: input, shape index: {}]   ;;  %s1366_s1 = inlined_call_operand.vmem [shape: bf16[576,128], index: 1, kind: input, shape index: {}]   ;;  %s1367_s2 = inlined_call_operand.vmem [shape: f32[1,128], index: 2, kind: input, shape index: {}]   ;;  %s1368_s3 = inlined_call_operand.vmem [shape: bf16[128,256], index: 3, kind: input, shape index: {}]   ;;  %s1369_s4 = inlined_call_operand.vmem [shape: f32[1,256], index: 4, kind: input, shape index: {}]   ;;  %s1370_s5 = inlined_call_operand.vmem [shape: bf16[256,6], index: 5, kind: input, shape index: {}]   ;;  %s1371_s6 = inlined_call_operand.vmem [shape: f32[1,6], index: 6, kind: input, shape index: {}]   ;;  %s1372_s7 = inlined_call_operand.hbm [shape: f32[2,6], index: 7, kind: output, shape index: {}]  }
   0x1   :  { %v997_v0 = vld [vmem:[%s1366_s1 + $0x78] sm:$0xff]   ;;  %v1001_v4 = vld [vmem:[%s1366_s1 + $0x70] sm:$0xff]   ;;  %v1005_v8 = vld [vmem:[%s1366_s1 + $0x68] sm:$0xff]   ;;  %v111_v33 = vunpack.c.l.s4 %v1096_v32 }
   0x2   :  { %v998_v1 = vld [vmem:[%s1366_s1 + $0x38] sm:$0xff]   ;;  %909 = vmatprep.subr.bf16.mxu0 %v997_v0  ;;  %v1002_v5 = vld [vmem:[%s1366_s1 + $0x30] sm:$0xff]   ;;  %v1006_v9 = vld [vmem:[%s1366_s1 + $0x28] sm:$0xff]   ;;  %v1234_v34 = vshrl.u32 %v113_v29, 7 }
   0x3   :  { %v999_v2 = vld [vmem:[%s1366_s1 + $0xf8] sm:$0xff]   ;;  %910 = vmatpush3.bf16.msra.mxu0 %v998_v1  ;;  %v1003_v6 = vld [vmem:[%s1366_s1 + $0xf0] sm:$0xff]   ;;  %v1007_v10 = vld [vmem:[%s1366_s1 + $0xe8] sm:$0xff]   ;;  %v112_v37 = vunpack.c.0.s8 %v111_v33 }
   0x4   :  { %v1000_v3 = vld [vmem:[%s1366_s1 + $0xb8] sm:$0xff]   ;;  %931 = vmatprep.subr.bf16.mxu1 %v999_v2  ;;  %911 = vmatprep.subr.bf16.mxu0 %v1001_v4  ;;  %v1004_v7 = vld [vmem:[%s1366_s1 + $0xb0] sm:$0xff]   ;;  %v1008_v11 = vld [vmem:[%s1366_s1 + $0xa8] sm:$0xff]  }
   0x5   :  { %932 = vmatpush3.bf16.msra.mxu1 %v1000_v3  ;;  %v1009_v12 = vld [vmem:[%s1366_s1 + $0x60] sm:$0xff]   ;;  %v1013_v16 = vld [vmem:[%s1366_s1 + $0x58] sm:$0xff]   ;;  %v1017_v20 = vld [vmem:[%s1366_s1 + $0x50] sm:$0xff]   ;;  %v115_v39 = vsub.s32 %v112_v37, %v1234_v34 }
   0x6   :  { %933 = vmatprep.subr.bf16.mxu1 %v1003_v6  ;;  %v1010_v13 = vld [vmem:[%s1366_s1 + $0x20] sm:$0xff]   ;;  %v1014_v17 = vld [vmem:[%s1366_s1 + $0x18] sm:$0xff]   ;;  %v1018_v21 = vld [vmem:[%s1366_s1 + $0x10] sm:$0xff]  }
   0x7   :  { %912 = vmatpush3.bf16.msra.mxu0 %v1002_v5  ;;  %v1011_v14 = vld [vmem:[%s1366_s1 + $0xe0] sm:$0xff]   ;;  %v1015_v18 = vld [vmem:[%s1366_s1 + $0xd8] sm:$0xff]   ;;  %v1019_v22 = vld [vmem:[%s1366_s1 + $0xd0] sm:$0xff]  }
   0x8   :  { %913 = vmatprep.subr.bf16.mxu0 %v1005_v8  ;;  %v1012_v15 = vld [vmem:[%s1366_s1 + $0xa0] sm:$0xff]   ;;  %v1016_v19 = vld [vmem:[%s1366_s1 + $0x98] sm:$0xff]   ;;  %v1020_v23 = vld [vmem:[%s1366_s1 + $0x90] sm:$0xff]  }
   0x9   :  { %934 = vmatpush3.bf16.msra.mxu1 %v1004_v7  ;;  %v1021_v24 = vld [vmem:[%s1366_s1 + $0x48] sm:$0xff]   ;;  %v1025_v28 = vld [vmem:[%s1366_s1 + $0x40] sm:$0xff]   ;;  %v1036_v40 = vld [vmem:[%s1368_s3 + $0x74] ss:$8 sps:$4 sm:$0xff]  }
   0xa   :  { %935 = vmatprep.subr.bf16.mxu1 %v1007_v10  ;;  %v1022_v25 = vld [vmem:[%s1366_s1 + $0x8] sm:$0xff]   ;;  %v1026_v30 = vld [vmem:[%s1366_s1] sm:$0xff]   ;;  %v1030_v44 = vld [vmem:[%s1366_s1 + $0x118] sm:$0xff]  }
   0xb   :  { %914 = vmatpush3.bf16.msra.mxu0 %v1006_v9  ;;  %v1023_v26 = vld [vmem:[%s1366_s1 + $0xc8] sm:$0xff]   ;;  %v1027_v31 = vld [vmem:[%s1366_s1 + $0xc0] sm:$0xff]   ;;  %v1034_v46 = vld [vmem:[%s1368_s3 + $0x70] ss:$8 sps:$4 sm:$0xff]  }
   0xc   :  { %915 = vmatprep.subr.bf16.mxu0 %v1009_v12  ;;  %v1024_v27 = vld [vmem:[%s1366_s1 + $0x88] sm:$0xff]   ;;  %v1029_v35 = vld [vmem:[%s1366_s1 + $0x80] sm:$0xff]   ;;  %v1031_v50 = vld [vmem:[%s1366_s1 + $0x110] sm:$0xff]  }
   0xd   :  { %936 = vmatpush3.bf16.msra.mxu1 %v1008_v11  ;;  %v28_v38 = vld [vmem:[%s1365_s0] sm:$0x1f]  ;;  %v1042_v52 = vld [vmem:[%s1368_s3 + $0x54] ss:$8 sps:$4 sm:$0xff]   ;;  %v1032_v53 = vld [vmem:[%s1366_s1 + $0x108] sm:$0xff]  }
   0xe   :  { %937 = vmatprep.subr.bf16.mxu1 %v1011_v14  ;;  %v116_v41 = vrot.slane %v28_v38, %v115_v39  ;;  %v1039_v48 = vld [vmem:[%s1368_s3 + $0x64] ss:$8 sps:$4 sm:$0xff]   ;;  %v1037_v51 = vld [vmem:[%s1368_s3 + $0x60] ss:$8 sps:$4 sm:$0xff]   ;;  %v109_v54 = vcombine.high %v28_v38, %v28_v38  ;;  %v1040_v55 = vld [vmem:[%s1368_s3 + $0x50] ss:$8 sps:$4 sm:$0xff]  }
   0xf   :  { %916 = vmatpush3.bf16.msra.mxu0 %v1010_v13  ;;  %v1033_v56 = vld [vmem:[%s1366_s1 + $0x100] sm:$0xff]  }
  0x10   :  { %917 = vmatprep.subr.bf16.mxu0 %v1013_v16  ;;  %v124_v42 = vcombine.high %v116_v41, %v116_v41  ;;  %v131_v43 = vrot.slane %v116_v41, %v115_v39  ;;  %v123_v57 = vrot.slane %v109_v54, %v115_v39 }
  0x11   :  { %938 = vmatpush3.bf16.msra.mxu1 %v1012_v15 }
  0x12   :  { %939 = vmatprep.subr.bf16.mxu1 %v1015_v18  ;;  %v145_v45 = vrot.slane %v124_v42, %v115_v39  ;;  %v146_v47 = vcombine.high %v131_v43, %v131_v43 }
  0x13   :  { %918 = vmatpush3.bf16.msra.mxu0 %v1014_v17 }
  0x14   :  { %919 = vmatprep.subr.bf16.mxu0 %v1017_v20  ;;  %404 = vmatprep.mubr.bf16.mxu0 %v145_v45  ;;  %v147_v49 = vcombine.high %v145_v45, %v145_v45 }
  0x15   :  { %940 = vmatpush3.bf16.msra.mxu1 %v1016_v19 }
  0x16   :  { %941 = vmatprep.subr.bf16.mxu1 %v1019_v22  ;;  %444 = vmatprep.mubr.bf16.mxu1 %v147_v49 }
  0x17   :  { %920 = vmatpush3.bf16.msra.mxu0 %v1018_v21 }
  0x18   :  { %921 = vmatprep.subr.bf16.mxu0 %v1021_v24 }
  0x19   :  { %942 = vmatpush3.bf16.msra.mxu1 %v1020_v23 }
  0x1a   :  { %943 = vmatprep.subr.bf16.mxu1 %v1023_v26 }
  0x1b   :  { %922 = vmatpush3.bf16.msra.mxu0 %v1022_v25 }
  0x1c   :  { %923 = vmatprep.subr.bf16.mxu0 %v1025_v28 }
  0x1d   :  { %944 = vmatpush3.bf16.msra.mxu1 %v1024_v27 }
  0x1e   :  { %945 = vmatprep.subr.bf16.mxu1 %v1027_v31 }
  0x1f   :  { %924 = vmatpush3.bf16.msra.mxu0 %v1026_v30 }
  0x20   :  { %980 = vmatprep.subr.bf16.mxu0 %v1097_v36 }
  0x21   :  { %946 = vmatpush3.bf16.msra.mxu1 %v1029_v35 }
  0x22   :  { %602 = vmatprep.subr.bf16.mxu1 %v1036_v40  ;;  %405 = vmatmul.mubr.bf16.vlgmr.msra.gmra.mxu0 %v131_v43 }
  0x23   :  { %981 = vmatpush3.bf16.msra.mxu0 %v1030_v44  ;;  %988 = vmatprep.mubr.msk.bf16.mxu0 %vm1098_vm0, %v1097_v36 }
  0x24   :  { %445 = vmatmul.mubr.bf16.vlgmr.msra.gmra.mxu1 %v146_v47  ;;  %982 = vmatprep.subr.bf16.mxu0 %v1097_v36 }
  0x25   :  { %603 = vmatpush1.bf16.msra.mxu1 %v1034_v46 }
  0x26   :  { %604 = vmatprep.subr.bf16.mxu1 %v1039_v48 }
  0x27   :  { %983 = vmatpush3.bf16.msra.mxu0 %v1031_v50 }
  0x28   :  { %984 = vmatprep.subr.bf16.mxu0 %v1097_v36 }
  0x29   :  { %605 = vmatpush1.bf16.msra.mxu1 %v1037_v51 }
  0x2a   :  { %606 = vmatprep.subr.bf16.mxu1 %v1042_v52 }
  0x2b   :  { %985 = vmatpush3.bf16.msra.mxu0 %v1032_v53 }
  0x2c   :  { %12 = vsyncpa [#allocation3], 0  ;;  %986 = vmatprep.subr.bf16.mxu0 %v1097_v36  ;;  %v138_v58 = vrot.slane %v123_v57, %v115_v39  ;;  %vm368_vm1 = vcmask 523264   ;;  %v1045_v59 = vld [vmem:[%s1368_s3 + $0x44] ss:$8 sps:$4 sm:$0xff]   ;;  %v1099_v5 = vmov 0  }
  0x2d   :  { %607 = vmatpush1.bf16.msra.mxu1 %v1040_v55  ;;  %v1043_v60 = vld [vmem:[%s1368_s3 + $0x40] ss:$8 sps:$4 sm:$0xff]   ;;  %v1048_v61 = vld [vmem:[%s1368_s3 + $0x34] ss:$8 sps:$4 sm:$0xff]   ;;  %v1046_v62 = vld [vmem:[%s1368_s3 + $0x30] ss:$8 sps:$4 sm:$0xff]   ;;  %634 = vmatprep.mubr.bf16.mxu1 %v1099_v5 }
  0x2e   :  { %608 = vmatprep.subr.bf16.mxu1 %v1045_v59  ;;  %v1049_v63 = vld [vmem:[%s1368_s3 + $0x20] ss:$8 sps:$4 sm:$0xff]   ;;  %v1051_v0 = vld [vmem:[%s1368_s3 + $0x24] ss:$8 sps:$4 sm:$0xff]   ;;  %v1054_v1 = vld [vmem:[%s1368_s3 + $0x14] ss:$8 sps:$4 sm:$0xff]  }
  0x2f   :  { %987 = vmatpush3.bf16.msra.mxu0 %v1033_v56  ;;  %v1052_v2 = vld [vmem:[%s1368_s3 + $0x10] ss:$8 sps:$4 sm:$0xff]   ;;  %v1057_v3 = vld [vmem:[%s1368_s3 + $0x4] ss:$8 sps:$4 sm:$0xff]   ;;  %v1055_v4 = vld [vmem:[%s1368_s3] ss:$8 sps:$4 sm:$0xff]  }
  0x30   :  { %v1058_v6 = vld [vmem:[%s1370_s5 + $0x78] sm:$0xff]   ;;  %v1060_v8 = vld [vmem:[%s1370_s5 + $0x70] sm:$0xff]   ;;  %v1062_v10 = vld [vmem:[%s1370_s5 + $0x68] sm:$0xff]   ;;  %v514_v43 = vsub.s32 0, %v1234_v34  ;;  %v518_v45 = vsub.s32 1, %v1234_v34  ;;  %vm822_vm2 = vcmask 41984  }
  0x31   :  { %609 = vmatpush1.bf16.msra.mxu1 %v1043_v60  ;;  %v1059_v7 = vld [vmem:[%s1370_s5 + $0x38] sm:$0xff]   ;;  %958 = vmatprep.subr.bf16.mxu0 %v1058_v6  ;;  %v1061_v9 = vld [vmem:[%s1370_s5 + $0x30] sm:$0xff]   ;;  %v1063_v11 = vld [vmem:[%s1370_s5 + $0x28] sm:$0xff]  }
  0x32   :  { %989 = vmatmul.mubr.msk.bf16.vlgmr.msra.gmra.mxu0 %vm368_vm1, %v138_v58  ;;  %610 = vmatprep.subr.bf16.mxu1 %v1048_v61  ;;  %v1064_v12 = vld [vmem:[%s1370_s5 + $0x60] sm:$0xff]   ;;  %v1066_v14 = vld [vmem:[%s1370_s5 + $0x58] sm:$0xff]   ;;  %v1068_v16 = vld [vmem:[%s1370_s5 + $0x50] sm:$0xff]  }
  0x33   :  { %959 = vmatpush3.bf16.msra.mxu0 %v1059_v7  ;;  %v1065_v13 = vld [vmem:[%s1370_s5 + $0x20] sm:$0xff]   ;;  %v1067_v15 = vld [vmem:[%s1370_s5 + $0x18] sm:$0xff]   ;;  %v1069_v17 = vld [vmem:[%s1370_s5 + $0x10] sm:$0xff]  }
  0x34   :  { %960 = vmatprep.subr.bf16.mxu0 %v1060_v8  ;;  %v838_v26 = vld [vmem:[%s1367_s2] ss:$0 sm:$0xff]  ;;  %v1070_v39 = vld [vmem:[%s1370_s5 + $0x48] sm:$0xff]  }
  0x35   :  { %611 = vmatpush1.bf16.msra.mxu1 %v1046_v62  ;;  %v1071_v40 = vld [vmem:[%s1370_s5 + $0x8] sm:$0xff]   ;;  %v1072_v41 = vld [vmem:[%s1370_s5 + $0x40] sm:$0xff]  }
  0x36   :  { %612 = vmatprep.subr.bf16.mxu1 %v1051_v0  ;;  %v1073_v42 = vld [vmem:[%s1370_s5] sm:$0xff]  }
  0x37   :  { %961 = vmatpush3.bf16.msra.mxu0 %v1061_v9  ;;  %v510_v44 = vld [vmem:[%s1369_s4] sm:$0x3]  ;;  %s1100_s4 = smov [#allocation2]  }
  0x38   :  { %962 = vmatprep.subr.bf16.mxu0 %v1062_v10  ;;  %v515_v46 = vrot.slane %v510_v44, %v514_v43  ;;  %v519_v47 = vrot.slane %v510_v44, %v518_v45  ;;  %v892_v59 = vld [vmem:[%s1371_s6] ss:$0 sm:$0xff]  ;;  %s830_s1 = sshll.u32 %s1100_s4, 4  ;;  %s831_s1 = int_to_ptr.vmem [resolvable:$true] %s830_s1 }
  0x39   :  { %613 = vmatpush1.bf16.msra.mxu1 %v1049_v63  ;;  %s1074_s21 = scalar_lea.vmem %s831_s1, 32  ;;  %p1079_p1 = scmp.lt.s32.totalorder %s831_s1, %s831_s1 }
  0x3a   :  { %614 = vmatprep.subr.bf16.mxu1 %v1054_v1  ;;  %p1075_p0 = scmp.ne.s32.totalorder %s831_s1, %s1074_s21  ;;  %p1080_p2 = scmp.lt.s32.totalorder %s1074_s21, %s1074_s21 }
  0x3b   :  { %963 = vmatpush3.bf16.msra.mxu0 %v1063_v11 }
  0x3c   :  { %964 = vmatprep.subr.bf16.mxu0 %v1064_v12  ;;  %p1081_p3 = por %p1080_p2, %p1079_p1 }
  0x3d   :  { %615 = vmatpush1.bf16.msra.mxu1 %v1052_v2 }
  0x3e   :  { %616 = vmatprep.subr.bf16.mxu1 %v1057_v3  ;;  %p1082_p4 = pnand %p1081_p3, %p1075_p0 }
  0x3f   :  { %965 = vmatpush3.bf16.msra.mxu0 %v1065_v13 }
  0x40   :  { %966 = vmatprep.subr.bf16.mxu0 %v1066_v14 }
  0x41   :  { %617 = vmatpush1.bf16.msra.mxu1 %v1055_v4 }
  0x43   :  { %967 = vmatpush3.bf16.msra.mxu0 %v1067_v15 }
  0x44   :  { %968 = vmatprep.subr.bf16.mxu0 %v1068_v16 }
  0x47   :  { %969 = vmatpush3.bf16.msra.mxu0 %v1069_v17 }
  0x48   :  { %970 = vmatprep.subr.bf16.mxu0 %v1070_v39 }
  0x4b   :  { %971 = vmatpush3.bf16.msra.mxu0 %v1071_v40 }
  0x4c   :  { %972 = vmatprep.subr.bf16.mxu0 %v1072_v41 }
  0x4f   :  { %973 = vmatpush3.bf16.msra.mxu0 %v1073_v42 }
  0xe2   :  { %v925_v18 = vpop.f32.mrf.mxu0 }
  0xe4   :  { %v926_v19 = vpop.f32.mrf.mxu0  ;;  %v947_v20 = vpop.f32.mrf.mxu1 }
  0xe5   :  { %v927_v25 = vadd.f32 %v926_v19, %v925_v18 }
  0xe6   :  { %v928_v21 = vpop.f32.mrf.mxu0  ;;  %v948_v22 = vpop.f32.mrf.mxu1 }
  0xe7   :  { %v407_v28 = vadd.f32 %v927_v25, %v838_v26  ;;  %v949_v29 = vadd.f32 %v948_v22, %v947_v20 }
  0xe8   :  { %v929_v23 = vpop.f32.mrf.mxu0  ;;  %v950_v24 = vpop.f32.mrf.mxu1 }
  0xe9   :  { %v447_v30 = vadd.f32 %v949_v29, %v407_v28 }
  0xea   :  { %v951_v27 = vpop.f32.mrf.mxu1 }
  0xf2   :  { %v486_v31 = vpop.f32.mrf.mxu0 }
  0xf3   :  { %v487_v32 = vadd.f32 %v486_v31, %v447_v30 }
  0xf4   :  { %v990_v33 = vpop.f32.mrf.mxu0 }
  0xf5   :  { %v492_v35 = vmax.f32 %v487_v32, 0.0 }
  0xf6   :  { %v489_v36 = vpop.f32.mrf.mxu0 }
  0xf7   :  { %v493_v37 = vpack.c.bf16 %v492_v35, %v492_v35 }
  0xf8   :  { %v991_v38 = vpop.f32.mrf.mxu0 }
  0xf9   :  { %635 = vmatmul.mubr.bf16.vlgmr.msra.gmra.mxu1 %v493_v37 }
 0x1b9   :  { %v636_v48 = vpop.f32.mrf.mxu1 }
 0x1ba   :  { %v637_v49 = vadd.f32 %v636_v48, %v515_v46 }
 0x1bb   :  { %v638_v50 = vpop.f32.mrf.mxu1 }
 0x1bc   :  { %v639_v51 = vadd.f32 %v638_v50, %v519_v47  ;;  %v643_v52 = vmax.f32 %v637_v49, 0.0 }
 0x1bd   :  { %v640_v53 = vpop.f32.mrf.mxu1 }
 0x1be   :  { %v644_v54 = vmax.f32 %v639_v51, 0.0  ;;  %v645_v57 = vpack.c.bf16 %v643_v52, %v643_v52 }
 0x1bf   :  { %v641_v55 = vpop.f32.mrf.mxu1 }
 0x1c0   :  { %v646_v56 = vpack.c.bf16 %v644_v54, %v644_v54 }
 0x1c2   :  { %814 = vmatprep.mubr.bf16.mxu0 %v646_v56 }
 0x1c3   :  { %815 = vmatmul.mubr.bf16.vlgmr.msra.gmra.mxu0 %v645_v57 }
 0x283   :  { %v974_v58 = vpop.f32.mrf.mxu0 }
 0x285   :  { %v975_v34 = vpop.f32.mrf.mxu0 }
 0x286   :  { %v976_v60 = vadd.f32 %v975_v34, %v974_v58 }
 0x287   :  { %v977_v61 = vpop.f32.mrf.mxu0 }
 0x288   :  { %v817_v62 = vadd.f32 %v976_v60, %v892_v59 }
 0x289   :  { %v978_v63 = vpop.f32.mrf.mxu0 }
 0x28a   :  { %823 = vst.msk [vmem:[#allocation2] sm:$0x3] %vm822_vm2, %v817_v62 }
 0x28b   :  { %1085 = shalt.err (!%p1082_p4)
}
 0x28c   :  { %833 = dma.vmem_to_hbm [thread:$0]  %s831_s1, 32, %s1372_s7, [#allocation3]  }
 0x28d   :  { %1094 = dma.done.wait [#allocation3], 32  }
 0x28e   :  { %1095 = vsyncadd [#allocation3], 4294967264 }
 0x28f   :  { %837 = vsyncpa [#allocation3], 1 }

</bundles_post_ra>
